<compile_context>
chip_gen: v6e
topology: v6e:2x2x1
jax: 0.10.0
libtpu: 0.0.40
codegen_flags: <defaults>
</compile_context>

<pallas_src>
import functools

import jax
import jax.numpy as jnp
import numpy as np
from jax.experimental import pallas as pl
from jax.experimental.pallas import tpu as pltpu


# ----------------------------- kernel ---------------------------------------


def _layernorm(x, g, b, eps=1e-5):
    # LayerNorm subclass in the module always computes in float32.
    xf = x.astype(jnp.float32)
    mu = jnp.mean(xf, axis=-1, keepdims=True)
    var = jnp.mean((xf - mu) ** 2, axis=-1, keepdims=True)
    return (xf - mu) * jax.lax.rsqrt(var + eps) * g + b


def transformer_kernel(
    x_ref,
    ln1_g, ln1_b, w_qkv, b_qkv, w_o, b_o,
    ln2_g, ln2_b, w_fc, b_fc, w_pr, b_pr,
    o_ref,
    carry_ref,
    *, n_head, seq_len,
):
    """One grid step = (batch tile, layer l).  Residual stream is carried in a f32
    VMEM scratch across the layer axis; output is written on the last layer only.
    NOTE: the out BlockSpec is constant over the layer axis (accumulator pattern) —
    the layer axis must stay innermost and 'arbitrary'."""
    layer = pl.program_id(1)
    n_layers = pl.num_programs(1)

    # ---- load the residual stream (from HBM input on layer 0) ----
    @pl.when(layer == 0)
    def _():
        carry_ref[...] = x_ref[...].astype(jnp.float32)

    x = carry_ref[...]                            # (B, Lp, D) float32
    B, Lp, D = x.shape
    hd = D // n_head

    # ---- attention branch: x = x + attn(ln_1(x)) ----
    xn = _layernorm(x, ln1_g[0, 0], ln1_b[0, 0])
    # one big MXU matmul over all B*Lp tokens; w_qkv pre-transposed + pre-scaled (bf16).
    qkv = jnp.dot(xn.reshape(B * Lp, D).astype(jnp.bfloat16), w_qkv[0],
                  preferred_element_type=jnp.float32) + b_qkv[0, 0]   # (B*Lp, 3D) f32

    attn_rows = []
    for b in range(B):                            # static, small (B_TILE)
        qkv_b = qkv[b * Lp:(b + 1) * Lp].astype(jnp.bfloat16)          # (Lp, 3D)
        q = jnp.transpose(qkv_b[:, 0 * D:1 * D].reshape(Lp, n_head, hd), (1, 0, 2))
        k = jnp.transpose(qkv_b[:, 1 * D:2 * D].reshape(Lp, n_head, hd), (1, 0, 2))
        v = jnp.transpose(qkv_b[:, 2 * D:3 * D].reshape(Lp, n_head, hd), (1, 0, 2))

        # scale was folded into w_qkv / b_qkv at pack time
        s = jnp.einsum('hld,hmd->hlm', q, k,
                       preferred_element_type=jnp.float32)              # (H, Lp, Lp)

        if seq_len < Lp:
            key_idx = jax.lax.broadcasted_iota(jnp.int32, s.shape, 2)
            s = jnp.where(key_idx < seq_len, s, -1e30)
        # TODO(synk): causal attn_mask (CLIP text tower) not implemented; module default
        # attn_mask=None is asserted in the wrapper.

        s = s - jnp.max(s, axis=-1, keepdims=True)
        p = jnp.exp(s)
        # approx reciprocal (EUP slot); keep an exact-divide fallback if reused for training.
        p = p * pl.reciprocal(jnp.sum(p, axis=-1, keepdims=True), approx=True)

        o_b = jnp.einsum('hlm,hmd->hld', p.astype(jnp.bfloat16), v,
                         preferred_element_type=jnp.float32)            # (H, Lp, hd)
        attn_rows.append(jnp.transpose(o_b, (1, 0, 2)).reshape(Lp, D))

    attn = jnp.concatenate(attn_rows, axis=0)      # (B*Lp, D) f32
    attn = jnp.dot(attn.astype(jnp.bfloat16), w_o[0],
                   preferred_element_type=jnp.float32) + b_o[0, 0]
    x = x + attn.reshape(B, Lp, D)

    # ---- MLP branch: x = x + c_proj(QuickGELU(c_fc(ln_2(x)))) ----
    xn2 = _layernorm(x, ln2_g[0, 0], ln2_b[0, 0])
    h = jnp.dot(xn2.reshape(B * Lp, D).astype(jnp.bfloat16), w_fc[0],
                preferred_element_type=jnp.float32) + b_fc[0, 0]
    h = h * jax.nn.sigmoid(1.702 * h)              # QuickGELU (f32; bf16 EUP option on v6e/v7x)
    mlp = jnp.dot(h.astype(jnp.bfloat16), w_pr[0],
                  preferred_element_type=jnp.float32) + b_pr[0, 0]
    x = x + mlp.reshape(B, Lp, D)

    carry_ref[...] = x

    @pl.when(layer == n_layers - 1)
    def _():
        o_ref[...] = x.astype(o_ref.dtype)


# ----------------------------- wrapper ---------------------------------------


def _per_layer_weight_bytes(packed):
    return sum(int(np.prod(p.shape[1:])) * p.dtype.itemsize for p in packed)


def _vmem_plan(N, Lp, D, n_head, packed):
    """Pick (B_TILE, vmem_limit_bytes) from real footprint accounting, per generation."""
    try:
        phys = int(pltpu.get_tpu_info().vmem_capacity_bytes)
    except Exception:                               # pragma: no cover
        phys = 64 * 2**20                           # conservative (v7x-sized) fallback
    cap = int(phys * 0.85)                          # headroom for compiler scratch/metadata

    w_bytes = _per_layer_weight_bytes(packed)       # one layer of (bf16) weights
    act = Lp * D * 4                                # one (Lp, D) f32 slab
    # shared (roughly B_TILE-independent): double-buffered weights + live score buffers
    shared = 2 * w_bytes + 2 * n_head * Lp * Lp * 4 + (2 << 20)
    # per batch element: carry + double-buffered x/out blocks + qkv + MLP hidden (f32+bf16)
    per_b = 5 * act + Lp * 3 * D * 4 + Lp * 4 * D * 4 + Lp * 4 * D * 2

    b_tile = max(1, min(N, 8, (cap - shared) // max(per_b, 1)))
    est = shared + b_tile * per_b
    vmem_req = int(min(cap, max(32 * 2**20, 2 * est)))
    return int(b_tile), vmem_req


def transformer_forward_pallas(x_nld, packed, n_head, seq_len, b_tile, vmem_limit):
    """x_nld: (Np, Lp, D) float32 (Lp padded to a multiple of 16, Np to B_TILE).
    packed: list of stacked per-layer params (leading dim = layers)."""
    Np, Lp, D = x_nld.shape
    n_layers = packed[0].shape[0]

    x_spec = pl.BlockSpec((b_tile, Lp, D), lambda b, l: (b, 0, 0))
    # layer-indexed weight blocks: the pipeline prefetches layer l+1 while l computes
    w_specs = [pl.BlockSpec((1,) + p.shape[1:], lambda b, l: (l, 0, 0)) for p in packed]

    return pl.pallas_call(
        functools.partial(transformer_kernel, n_head=n_head, seq_len=seq_len),
        out_shape=jax.ShapeDtypeStruct((Np, Lp, D), x_nld.dtype),
        grid=(Np // b_tile, n_layers),
        in_specs=[x_spec] + w_specs,
        out_specs=x_spec,
        scratch_shapes=[pltpu.VMEM((b_tile, Lp, D), jnp.float32)],   # residual-stream carry
        compiler_params=pltpu.CompilerParams(
            dimension_semantics=("parallel", "arbitrary"),
            vmem_limit_bytes=vmem_limit,
        ),
    )(x_nld, *packed)


def init_block_params(key, width):
    """Per-layer params in PyTorch layout (f32): w_* are (out, in)."""
    D = width
    ks = jax.random.split(key, 6)
    s = 0.02

    def r2(k, shape):
        return jax.random.normal(k, shape, jnp.float32) * s

    return {
        "ln1_g": jnp.ones((1, D), jnp.float32),
        "ln1_b": jnp.zeros((1, D), jnp.float32),
        "w_qkv": r2(ks[0], (3 * D, D)),
        "b_qkv": r2(ks[1], (1, 3 * D)),
        "w_o":   r2(ks[2], (D, D)),
        "b_o":   jnp.zeros((1, D), jnp.float32),
        "ln2_g": jnp.ones((1, D), jnp.float32),
        "ln2_b": jnp.zeros((1, D), jnp.float32),
        "w_fc":  r2(ks[3], (4 * D, D)),
        "b_fc":  r2(ks[4], (1, 4 * D)),
        "w_pr":  r2(ks[5], (D, 4 * D)),
        "b_pr":  jnp.zeros((1, D), jnp.float32),
    }


def pack_layer_params(params_list, n_head):
    """Stack per-layer params along a leading layer dim, pre-transpose weight matrices
    to (in, out) layout, cast matmul weights to bf16, and fold the attention scale
    1/sqrt(head_dim) into the Q rows of w_qkv and b_qkv."""
    D = params_list[0]["ln1_g"].shape[-1]
    hd = D // n_head
    scale = 1.0 / float(np.sqrt(hd))
    scale_vec = jnp.concatenate(
        [jnp.full((D,), scale, jnp.float32), jnp.ones((2 * D,), jnp.float32)])

    def stack_f32(key):
        return jnp.stack([p[key] for p in params_list], axis=0)

    def stack_w_t(key):
        return jnp.stack([p[key].T for p in params_list], axis=0).astype(jnp.bfloat16)

    w_qkv = jnp.stack(
        [(p["w_qkv"] * scale_vec[:, None]).T for p in params_list], axis=0
    ).astype(jnp.bfloat16)                                           # (Lyr, D, 3D)
    b_qkv = jnp.stack(
        [p["b_qkv"] * scale_vec[None, :] for p in params_list], axis=0)  # (Lyr, 1, 3D)

    return [
        stack_f32("ln1_g"), stack_f32("ln1_b"),      # (Lyr, 1, D)
        w_qkv, b_qkv,                                # bf16 / f32
        stack_w_t("w_o"),   stack_f32("b_o"),        # (Lyr, D, D)  bf16, (Lyr, 1, D)
        stack_f32("ln2_g"), stack_f32("ln2_b"),      # (Lyr, 1, D)
        stack_w_t("w_fc"),  stack_f32("b_fc"),       # (Lyr, D, 4D) bf16, (Lyr, 1, 4D)
        stack_w_t("w_pr"),  stack_f32("b_pr"),       # (Lyr, 4D, D) bf16, (Lyr, 1, D)
    ]


class TransformerPallas:
    """Equivalent of Transformer(width, layers, heads, attn_mask=None)."""

    def __init__(self, width, layers, heads, key, attn_mask=None):
        if attn_mask is not None:
            # TODO(synk): additive/causal attn_mask (CLIP text tower) not implemented.
            raise NotImplementedError("attn_mask is not supported by this kernel")
        self.width = width
        self.layers = layers
        self.heads = heads
        keys = jax.random.split(key, layers)
        self.params = [init_block_params(k, width) for k in keys]   # reference layout
        self.packed = pack_layer_params(self.params, heads)         # kernel layout

    def __call__(self, x_lnd):
        # input: (L, N, D) seq-first, like the PyTorch module
        L, N, D = x_lnd.shape
        x = jnp.transpose(x_lnd, (1, 0, 2))              # (N, L, D)
        Lp = ((L + 15) // 16) * 16                       # bf16 sublane-friendly padding
        if Lp != L:
            x = jnp.pad(x, ((0, 0), (0, Lp - L), (0, 0)))
        b_tile, vmem_req = _vmem_plan(N, Lp, D, self.heads, self.packed)
        Np = ((N + b_tile - 1) // b_tile) * b_tile       # pad batch to the batch tile
        if Np != N:
            x = jnp.pad(x, ((0, Np - N), (0, 0), (0, 0)))
        y = transformer_forward_pallas(x, self.packed, self.heads, seq_len=L,
                                       b_tile=b_tile, vmem_limit=vmem_req)
        y = y[:N, :L]
        return jnp.transpose(y, (1, 0, 2))               # (L, N, D)


# ----------------------------- pure-JAX reference -----------------------------


def _ref_block(x_nld, p, n_head):
    N, L, D = x_nld.shape
    hd = D // n_head
    out = []
    for b in range(N):
        x = x_nld[b].astype(jnp.float32)
        xn = _layernorm(x, p["ln1_g"][0], p["ln1_b"][0])
        qkv = xn @ p["w_qkv"].T + p["b_qkv"][0]
        q, k, v = qkv[:, :D], qkv[:, D:2 * D], qkv[:, 2 * D:]
        heads = []
        for h in range(n_head):
            qh = q[:, h * hd:(h + 1) * hd]
            kh = k[:, h * hd:(h + 1) * hd]
            vh = v[:, h * hd:(h + 1) * hd]
            s = (qh @ kh.T) / (hd ** 0.5)
            heads.append(jax.nn.softmax(s, axis=-1) @ vh)
        attn = jnp.concatenate(heads, axis=-1) @ p["w_o"].T + p["b_o"][0]
        x = x + attn
        xn2 = _layernorm(x, p["ln2_g"][0], p["ln2_b"][0])
        hdn = xn2 @ p["w_fc"].T + p["b_fc"][0]
        hdn = hdn * jax.nn.sigmoid(1.702 * hdn)
        x = x + (hdn @ p["w_pr"].T + p["b_pr"][0])
        out.append(x)
    return jnp.stack(out, axis=0)


def _ref_transformer(model, x_lnd):
    x = jnp.transpose(x_lnd, (1, 0, 2))
    for p in model.params:
        x = _ref_block(x, p, model.heads)
    return jnp.transpose(x, (1, 0, 2))


# ----------------------------- main -------------------------------------------


if __name__ == "__main__":
    L, N, D, H, LAYERS = 8, 2, 32, 4, 2
    key = jax.random.PRNGKey(0)
    k_x, k_w = jax.random.split(key)

    x = jax.random.normal(k_x, (L, N, D), jnp.float32)   # seq-first (L, N, D)

    model = TransformerPallas(width=D, layers=LAYERS, heads=H, key=k_w)

    y = jax.block_until_ready(model(x))

    y_ref = _ref_transformer(model, x)
    assert y.shape == (L, N, D)
    # bf16 matmul weights + approx reciprocal => slightly looser tolerance than pure f32
    np.testing.assert_allclose(np.asarray(y), np.asarray(y_ref), atol=1e-2, rtol=1e-2)

    print("KERNEL_OK")
</pallas_src>

<mosaic_0001>
module attributes {stable_mosaic.version = 11 : i64} {
  func.func @transformer_kernel(%arg0: i32, %arg1: i32, %arg2: memref<2x16x32xf32, #tpu.memory_space<vmem>>, %arg3: memref<1x1x32xf32, #tpu.memory_space<vmem>>, %arg4: memref<1x1x32xf32, #tpu.memory_space<vmem>>, %arg5: memref<1x32x96xbf16, #tpu.memory_space<vmem>>, %arg6: memref<1x1x96xf32, #tpu.memory_space<vmem>>, %arg7: memref<1x32x32xbf16, #tpu.memory_space<vmem>>, %arg8: memref<1x1x32xf32, #tpu.memory_space<vmem>>, %arg9: memref<1x1x32xf32, #tpu.memory_space<vmem>>, %arg10: memref<1x1x32xf32, #tpu.memory_space<vmem>>, %arg11: memref<1x32x128xbf16, #tpu.memory_space<vmem>>, %arg12: memref<1x1x128xf32, #tpu.memory_space<vmem>>, %arg13: memref<1x128x32xbf16, #tpu.memory_space<vmem>>, %arg14: memref<1x1x32xf32, #tpu.memory_space<vmem>>, %arg15: memref<2x16x32xf32, #tpu.memory_space<vmem>>, %arg16: memref<2x16x32xf32, #tpu.memory_space<vmem>>) attributes {dimension_semantics = [#tpu.dimension_semantics<parallel>, #tpu.dimension_semantics<arbitrary>], iteration_bounds = array<i64: 1, 2>, scalar_prefetch = 0 : i64, scratch_operands = 1 : i64, tpu.core_type = #tpu.core_type<tc>, window_params = [{transform_indices = @transform_0, window_bounds = array<i64: 2, 16, 32>}, {transform_indices = @transform_1, window_bounds = array<i64: 1, 1, 32>}, {transform_indices = @transform_2, window_bounds = array<i64: 1, 1, 32>}, {transform_indices = @transform_3, window_bounds = array<i64: 1, 32, 96>}, {transform_indices = @transform_4, window_bounds = array<i64: 1, 1, 96>}, {transform_indices = @transform_5, window_bounds = array<i64: 1, 32, 32>}, {transform_indices = @transform_6, window_bounds = array<i64: 1, 1, 32>}, {transform_indices = @transform_7, window_bounds = array<i64: 1, 1, 32>}, {transform_indices = @transform_8, window_bounds = array<i64: 1, 1, 32>}, {transform_indices = @transform_9, window_bounds = array<i64: 1, 32, 128>}, {transform_indices = @transform_10, window_bounds = array<i64: 1, 1, 128>}, {transform_indices = @transform_11, window_bounds = array<i64: 1, 128, 32>}, {transform_indices = @transform_12, window_bounds = array<i64: 1, 1, 32>}, {transform_indices = @transform_13, window_bounds = array<i64: 2, 16, 32>}]} {
    %c0_i32 = arith.constant 0 : i32
    %0 = arith.cmpi eq, %arg1, %c0_i32 : i32
    %1 = arith.extui %0 : i1 to i32
    %c0_i32_0 = arith.constant 0 : i32
    %2 = arith.cmpi ne, %1, %c0_i32_0 : i32
    scf.if %2 {
      %c0_69 = arith.constant 0 : index
      %c0_70 = arith.constant 0 : index
      %c0_71 = arith.constant 0 : index
      %177 = vector.load %arg2[%c0_69, %c0_70, %c0_71] : memref<2x16x32xf32, #tpu.memory_space<vmem>>, vector<2x16x32xf32>
      %c0_72 = arith.constant 0 : index
      %c0_73 = arith.constant 0 : index
      %c0_74 = arith.constant 0 : index
      %178 = vector.load %arg16[%c0_72, %c0_73, %c0_74] : memref<2x16x32xf32, #tpu.memory_space<vmem>>, vector<2x16x32xf32>
      tpu.vector_store %arg16[%c0_72, %c0_73, %c0_74], %177 {strides = array<i32>} : memref<2x16x32xf32, #tpu.memory_space<vmem>>, vector<2x16x32xf32>,
    } else {
    }
    %c0 = arith.constant 0 : index
    %c0_1 = arith.constant 0 : index
    %c0_2 = arith.constant 0 : index
    %3 = vector.load %arg16[%c0, %c0_1, %c0_2] : memref<2x16x32xf32, #tpu.memory_space<vmem>>, vector<2x16x32xf32>
    %c0_3 = arith.constant 0 : index
    %c0_4 = arith.constant 0 : index
    %c0_5 = arith.constant 0 : index
    %4 = vector.load %arg3[%c0_3, %c0_4, %c0_5] : memref<1x1x32xf32, #tpu.memory_space<vmem>>, vector<1x1x32xf32>
    %5 = vector.shape_cast %4 : vector<1x1x32xf32> to vector<32xf32>
    %c0_6 = arith.constant 0 : index
    %c0_7 = arith.constant 0 : index
    %c0_8 = arith.constant 0 : index
    %6 = vector.load %arg4[%c0_6, %c0_7, %c0_8] : memref<1x1x32xf32, #tpu.memory_space<vmem>>, vector<1x1x32xf32>
    %7 = vector.shape_cast %6 : vector<1x1x32xf32> to vector<32xf32>
    %cst = arith.constant dense<0.000000e+00> : vector<2x16xf32>
    %8 = vector.multi_reduction <add>, %3, %cst [2] : vector<2x16x32xf32> to vector<2x16xf32>
    %9 = vector.shape_cast %8 : vector<2x16xf32> to vector<2x16x1xf32>
    %cst_9 = arith.constant 3.200000e+01 : f32
    %10 = vector.broadcast %cst_9 : f32 to vector<2x16x1xf32>
    %11 = arith.divf %9, %10 : vector<2x16x1xf32>
    %12 = vector.broadcast %11 : vector<2x16x1xf32> to vector<2x16x32xf32>
    %13 = arith.subf %3, %12 : vector<2x16x32xf32>
    %14 = arith.mulf %13, %13 : vector<2x16x32xf32>
    %cst_10 = arith.constant dense<0.000000e+00> : vector<2x16xf32>
    %15 = vector.multi_reduction <add>, %14, %cst_10 [2] : vector<2x16x32xf32> to vector<2x16xf32>
    %16 = vector.shape_cast %15 : vector<2x16xf32> to vector<2x16x1xf32>
    %cst_11 = arith.constant 3.200000e+01 : f32
    %17 = vector.broadcast %cst_11 : f32 to vector<2x16x1xf32>
    %18 = arith.divf %16, %17 : vector<2x16x1xf32>
    %19 = vector.broadcast %11 : vector<2x16x1xf32> to vector<2x16x32xf32>
    %20 = arith.subf %3, %19 : vector<2x16x32xf32>
    %cst_12 = arith.constant 9.99999974E-6 : f32
    %21 = vector.broadcast %cst_12 : f32 to vector<2x16x1xf32>
    %22 = arith.addf %18, %21 : vector<2x16x1xf32>
    %23 = math.rsqrt %22 : vector<2x16x1xf32>
    %24 = vector.broadcast %23 : vector<2x16x1xf32> to vector<2x16x32xf32>
    %25 = arith.mulf %20, %24 : vector<2x16x32xf32>
    %26 = vector.shape_cast %5 : vector<32xf32> to vector<1x1x32xf32>
    %27 = vector.broadcast %26 : vector<1x1x32xf32> to vector<2x16x32xf32>
    %28 = arith.mulf %25, %27 : vector<2x16x32xf32>
    %29 = vector.shape_cast %7 : vector<32xf32> to vector<1x1x32xf32>
    %30 = vector.broadcast %29 : vector<1x1x32xf32> to vector<2x16x32xf32>
    %31 = arith.addf %28, %30 : vector<2x16x32xf32>
    %32 = vector.shape_cast %31 : vector<2x16x32xf32> to vector<32x32xf32>
    %33 = arith.truncf %32 : vector<32x32xf32> to vector<32x32xbf16>
    %c0_13 = arith.constant 0 : index
    %c0_14 = arith.constant 0 : index
    %c0_15 = arith.constant 0 : index
    %34 = vector.load %arg5[%c0_13, %c0_14, %c0_15] : memref<1x32x96xbf16, #tpu.memory_space<vmem>>, vector<1x32x96xbf16>
    %35 = vector.shape_cast %34 : vector<1x32x96xbf16> to vector<32x96xbf16>
    %cst_16 = arith.constant dense<0.000000e+00> : vector<32x96xf32>
    %36 = tpu.matmul %33, %35, %cst_16 {dimension_numbers = #tpu.dot_dimension_numbers<[1], [0], [0], [1], [0, 0, 1, 1], [], []>} : vector<32x32xbf16>, vector<32x96xbf16>, vector<32x96xf32> -> vector<32x96xf32>
    %c0_17 = arith.constant 0 : index
    %c0_18 = arith.constant 0 : index
    %c0_19 = arith.constant 0 : index
    %37 = vector.load %arg6[%c0_17, %c0_18, %c0_19] : memref<1x1x96xf32, #tpu.memory_space<vmem>>, vector<1x1x96xf32>
    %38 = vector.shape_cast %37 : vector<1x1x96xf32> to vector<96xf32>
    %39 = vector.shape_cast %38 : vector<96xf32> to vector<1x96xf32>
    %40 = vector.broadcast %39 : vector<1x96xf32> to vector<32x96xf32>
    %41 = arith.addf %36, %40 : vector<32x96xf32>
    %42 = vector.extract_strided_slice %41 {offsets = [0, 0], sizes = [16, 96], strides = [1, 1]} : vector<32x96xf32> to vector<16x96xf32>
    %43 = arith.truncf %42 : vector<16x96xf32> to vector<16x96xbf16>
    %44 = vector.extract_strided_slice %43 {offsets = [0, 0], sizes = [16, 32], strides = [1, 1]} : vector<16x96xbf16> to vector<16x32xbf16>
    %45 = vector.shape_cast %44 : vector<16x32xbf16> to vector<16x4x8xbf16>
    %46 = tpu.transpose %45, [1, 0, 2] : vector<16x4x8xbf16> -> vector<4x16x8xbf16>
    %47 = vector.extract_strided_slice %43 {offsets = [0, 32], sizes = [16, 32], strides = [1, 1]} : vector<16x96xbf16> to vector<16x32xbf16>
    %48 = vector.shape_cast %47 : vector<16x32xbf16> to vector<16x4x8xbf16>
    %49 = tpu.transpose %48, [1, 0, 2] : vector<16x4x8xbf16> -> vector<4x16x8xbf16>
    %50 = vector.extract_strided_slice %43 {offsets = [0, 64], sizes = [16, 32], strides = [1, 1]} : vector<16x96xbf16> to vector<16x32xbf16>
    %51 = vector.shape_cast %50 : vector<16x32xbf16> to vector<16x4x8xbf16>
    %52 = tpu.transpose %51, [1, 0, 2] : vector<16x4x8xbf16> -> vector<4x16x8xbf16>
    "tpu.trace_start"() <{level = 10 : i32, message = "hld,hmd->hlm"}> : () -> ()
    %cst_20 = arith.constant dense<0.000000e+00> : vector<4x16x16xf32>
    %53 = tpu.matmul %46, %49, %cst_20 {dimension_numbers = #tpu.dot_dimension_numbers<[2], [2], [1], [1], [0, 0, 0, 1, 1, 1], [0], [0]>} : vector<4x16x8xbf16>, vector<4x16x8xbf16>, vector<4x16x16xf32> -> vector<4x16x16xf32>
    "tpu.trace_stop"() : () -> ()
    %54 = tpu.iota {dimensions = array<i32: 2>} : vector<4x16x16xi32>
    %c8_i32 = arith.constant 8 : i32
    %55 = vector.broadcast %c8_i32 : i32 to vector<4x16x16xi32>
    %56 = arith.cmpi slt, %54, %55 : vector<4x16x16xi32>
    %cst_21 = arith.constant -1.000000e+30 : f32
    %57 = vector.broadcast %cst_21 : f32 to vector<4x16x16xf32>
    %58 = arith.select %56, %53, %57 : vector<4x16x16xi1>, vector<4x16x16xf32>
    %cst_22 = arith.constant dense<0xFF800000> : vector<4x16xf32>
    %59 = vector.multi_reduction <maximumf>, %58, %cst_22 [2] : vector<4x16x16xf32> to vector<4x16xf32>
    %60 = vector.shape_cast %59 : vector<4x16xf32> to vector<4x16x1xf32>
    %61 = vector.broadcast %60 : vector<4x16x1xf32> to vector<4x16x16xf32>
    %62 = arith.subf %58, %61 : vector<4x16x16xf32>
    %63 = math.exp %62 : vector<4x16x16xf32>
    %cst_23 = arith.constant dense<0.000000e+00> : vector<4x16xf32>
    %64 = vector.multi_reduction <add>, %63, %cst_23 [2] : vector<4x16x16xf32> to vector<4x16xf32>
    %65 = vector.shape_cast %64 : vector<4x16xf32> to vector<4x16x1xf32>
    %66 = tpu.reciprocal %65 {approx = true} : vector<4x16x1xf32> -> vector<4x16x1xf32>
    %67 = vector.broadcast %66 : vector<4x16x1xf32> to vector<4x16x16xf32>
    %68 = arith.mulf %63, %67 : vector<4x16x16xf32>
    %69 = arith.truncf %68 : vector<4x16x16xf32> to vector<4x16x16xbf16>
    "tpu.trace_start"() <{level = 10 : i32, message = "hlm,hmd->hld"}> : () -> ()
    %cst_24 = arith.constant dense<0.000000e+00> : vector<4x16x8xf32>
    %70 = tpu.matmul %69, %52, %cst_24 {dimension_numbers = #tpu.dot_dimension_numbers<[2], [1], [1], [2], [0, 0, 0, 1, 1, 2], [0], [0]>} : vector<4x16x16xbf16>, vector<4x16x8xbf16>, vector<4x16x8xf32> -> vector<4x16x8xf32>
    "tpu.trace_stop"() : () -> ()
    %71 = tpu.transpose %70, [1, 0, 2] : vector<4x16x8xf32> -> vector<16x4x8xf32>
    %72 = vector.shape_cast %71 : vector<16x4x8xf32> to vector<16x32xf32>
    %73 = vector.extract_strided_slice %41 {offsets = [16, 0], sizes = [16, 96], strides = [1, 1]} : vector<32x96xf32> to vector<16x96xf32>
    %74 = arith.truncf %73 : vector<16x96xf32> to vector<16x96xbf16>
    %75 = vector.extract_strided_slice %74 {offsets = [0, 0], sizes = [16, 32], strides = [1, 1]} : vector<16x96xbf16> to vector<16x32xbf16>
    %76 = vector.shape_cast %75 : vector<16x32xbf16> to vector<16x4x8xbf16>
    %77 = tpu.transpose %76, [1, 0, 2] : vector<16x4x8xbf16> -> vector<4x16x8xbf16>
    %78 = vector.extract_strided_slice %74 {offsets = [0, 32], sizes = [16, 32], strides = [1, 1]} : vector<16x96xbf16> to vector<16x32xbf16>
    %79 = vector.shape_cast %78 : vector<16x32xbf16> to vector<16x4x8xbf16>
    %80 = tpu.transpose %79, [1, 0, 2] : vector<16x4x8xbf16> -> vector<4x16x8xbf16>
    %81 = vector.extract_strided_slice %74 {offsets = [0, 64], sizes = [16, 32], strides = [1, 1]} : vector<16x96xbf16> to vector<16x32xbf16>
    %82 = vector.shape_cast %81 : vector<16x32xbf16> to vector<16x4x8xbf16>
    %83 = tpu.transpose %82, [1, 0, 2] : vector<16x4x8xbf16> -> vector<4x16x8xbf16>
    "tpu.trace_start"() <{level = 10 : i32, message = "hld,hmd->hlm"}> : () -> ()
    %cst_25 = arith.constant dense<0.000000e+00> : vector<4x16x16xf32>
    %84 = tpu.matmul %77, %80, %cst_25 {dimension_numbers = #tpu.dot_dimension_numbers<[2], [2], [1], [1], [0, 0, 0, 1, 1, 1], [0], [0]>} : vector<4x16x8xbf16>, vector<4x16x8xbf16>, vector<4x16x16xf32> -> vector<4x16x16xf32>
    "tpu.trace_stop"() : () -> ()
    %85 = tpu.iota {dimensions = array<i32: 2>} : vector<4x16x16xi32>
    %c8_i32_26 = arith.constant 8 : i32
    %86 = vector.broadcast %c8_i32_26 : i32 to vector<4x16x16xi32>
    %87 = arith.cmpi slt, %85, %86 : vector<4x16x16xi32>
    %cst_27 = arith.constant -1.000000e+30 : f32
    %88 = vector.broadcast %cst_27 : f32 to vector<4x16x16xf32>
    %89 = arith.select %87, %84, %88 : vector<4x16x16xi1>, vector<4x16x16xf32>
    %cst_28 = arith.constant dense<0xFF800000> : vector<4x16xf32>
    %90 = vector.multi_reduction <maximumf>, %89, %cst_28 [2] : vector<4x16x16xf32> to vector<4x16xf32>
    %91 = vector.shape_cast %90 : vector<4x16xf32> to vector<4x16x1xf32>
    %92 = vector.broadcast %91 : vector<4x16x1xf32> to vector<4x16x16xf32>
    %93 = arith.subf %89, %92 : vector<4x16x16xf32>
    %94 = math.exp %93 : vector<4x16x16xf32>
    %cst_29 = arith.constant dense<0.000000e+00> : vector<4x16xf32>
    %95 = vector.multi_reduction <add>, %94, %cst_29 [2] : vector<4x16x16xf32> to vector<4x16xf32>
    %96 = vector.shape_cast %95 : vector<4x16xf32> to vector<4x16x1xf32>
    %97 = tpu.reciprocal %96 {approx = true} : vector<4x16x1xf32> -> vector<4x16x1xf32>
    %98 = vector.broadcast %97 : vector<4x16x1xf32> to vector<4x16x16xf32>
    %99 = arith.mulf %94, %98 : vector<4x16x16xf32>
    %100 = arith.truncf %99 : vector<4x16x16xf32> to vector<4x16x16xbf16>
    "tpu.trace_start"() <{level = 10 : i32, message = "hlm,hmd->hld"}> : () -> ()
    %cst_30 = arith.constant dense<0.000000e+00> : vector<4x16x8xf32>
    %101 = tpu.matmul %100, %83, %cst_30 {dimension_numbers = #tpu.dot_dimension_numbers<[2], [1], [1], [2], [0, 0, 0, 1, 1, 2], [0], [0]>} : vector<4x16x16xbf16>, vector<4x16x8xbf16>, vector<4x16x8xf32> -> vector<4x16x8xf32>
    "tpu.trace_stop"() : () -> ()
    %102 = tpu.transpose %101, [1, 0, 2] : vector<4x16x8xf32> -> vector<16x4x8xf32>
    %103 = vector.shape_cast %102 : vector<16x4x8xf32> to vector<16x32xf32>
    %104 = tpu.concatenate %72, %103 in 0 : vector<16x32xf32>, vector<16x32xf32> -> vector<32x32xf32>
    %105 = arith.truncf %104 : vector<32x32xf32> to vector<32x32xbf16>
    %c0_31 = arith.constant 0 : index
    %c0_32 = arith.constant 0 : index
    %c0_33 = arith.constant 0 : index
    %106 = vector.load %arg7[%c0_31, %c0_32, %c0_33] : memref<1x32x32xbf16, #tpu.memory_space<vmem>>, vector<1x32x32xbf16>
    %107 = vector.shape_cast %106 : vector<1x32x32xbf16> to vector<32x32xbf16>
    %cst_34 = arith.constant dense<0.000000e+00> : vector<32x32xf32>
    %108 = tpu.matmul %105, %107, %cst_34 {dimension_numbers = #tpu.dot_dimension_numbers<[1], [0], [0], [1], [0, 0, 1, 1], [], []>} : vector<32x32xbf16>, vector<32x32xbf16>, vector<32x32xf32> -> vector<32x32xf32>
    %c0_35 = arith.constant 0 : index
    %c0_36 = arith.constant 0 : index
    %c0_37 = arith.constant 0 : index
    %109 = vector.load %arg8[%c0_35, %c0_36, %c0_37] : memref<1x1x32xf32, #tpu.memory_space<vmem>>, vector<1x1x32xf32>
    %110 = vector.shape_cast %109 : vector<1x1x32xf32> to vector<32xf32>
    %111 = vector.shape_cast %110 : vector<32xf32> to vector<1x32xf32>
    %112 = vector.broadcast %111 : vector<1x32xf32> to vector<32x32xf32>
    %113 = arith.addf %108, %112 : vector<32x32xf32>
    %114 = vector.shape_cast %113 : vector<32x32xf32> to vector<2x16x32xf32>
    %115 = arith.addf %3, %114 : vector<2x16x32xf32>
    %c0_38 = arith.constant 0 : index
    %c0_39 = arith.constant 0 : index
    %c0_40 = arith.constant 0 : index
    %116 = vector.load %arg9[%c0_38, %c0_39, %c0_40] : memref<1x1x32xf32, #tpu.memory_space<vmem>>, vector<1x1x32xf32>
    %117 = vector.shape_cast %116 : vector<1x1x32xf32> to vector<32xf32>
    %c0_41 = arith.constant 0 : index
    %c0_42 = arith.constant 0 : index
    %c0_43 = arith.constant 0 : index
    %118 = vector.load %arg10[%c0_41, %c0_42, %c0_43] : memref<1x1x32xf32, #tpu.memory_space<vmem>>, vector<1x1x32xf32>
    %119 = vector.shape_cast %118 : vector<1x1x32xf32> to vector<32xf32>
    %cst_44 = arith.constant dense<0.000000e+00> : vector<2x16xf32>
    %120 = vector.multi_reduction <add>, %115, %cst_44 [2] : vector<2x16x32xf32> to vector<2x16xf32>
    %121 = vector.shape_cast %120 : vector<2x16xf32> to vector<2x16x1xf32>
    %cst_45 = arith.constant 3.200000e+01 : f32
    %122 = vector.broadcast %cst_45 : f32 to vector<2x16x1xf32>
    %123 = arith.divf %121, %122 : vector<2x16x1xf32>
    %124 = vector.broadcast %123 : vector<2x16x1xf32> to vector<2x16x32xf32>
    %125 = arith.subf %115, %124 : vector<2x16x32xf32>
    %126 = arith.mulf %125, %125 : vector<2x16x32xf32>
    %cst_46 = arith.constant dense<0.000000e+00> : vector<2x16xf32>
    %127 = vector.multi_reduction <add>, %126, %cst_46 [2] : vector<2x16x32xf32> to vector<2x16xf32>
    %128 = vector.shape_cast %127 : vector<2x16xf32> to vector<2x16x1xf32>
    %cst_47 = arith.constant 3.200000e+01 : f32
    %129 = vector.broadcast %cst_47 : f32 to vector<2x16x1xf32>
    %130 = arith.divf %128, %129 : vector<2x16x1xf32>
    %131 = vector.broadcast %123 : vector<2x16x1xf32> to vector<2x16x32xf32>
    %132 = arith.subf %115, %131 : vector<2x16x32xf32>
    %cst_48 = arith.constant 9.99999974E-6 : f32
    %133 = vector.broadcast %cst_48 : f32 to vector<2x16x1xf32>
    %134 = arith.addf %130, %133 : vector<2x16x1xf32>
    %135 = math.rsqrt %134 : vector<2x16x1xf32>
    %136 = vector.broadcast %135 : vector<2x16x1xf32> to vector<2x16x32xf32>
    %137 = arith.mulf %132, %136 : vector<2x16x32xf32>
    %138 = vector.shape_cast %117 : vector<32xf32> to vector<1x1x32xf32>
    %139 = vector.broadcast %138 : vector<1x1x32xf32> to vector<2x16x32xf32>
    %140 = arith.mulf %137, %139 : vector<2x16x32xf32>
    %141 = vector.shape_cast %119 : vector<32xf32> to vector<1x1x32xf32>
    %142 = vector.broadcast %141 : vector<1x1x32xf32> to vector<2x16x32xf32>
    %143 = arith.addf %140, %142 : vector<2x16x32xf32>
    %144 = vector.shape_cast %143 : vector<2x16x32xf32> to vector<32x32xf32>
    %145 = arith.truncf %144 : vector<32x32xf32> to vector<32x32xbf16>
    %c0_49 = arith.constant 0 : index
    %c0_50 = arith.constant 0 : index
    %c0_51 = arith.constant 0 : index
    %146 = vector.load %arg11[%c0_49, %c0_50, %c0_51] : memref<1x32x128xbf16, #tpu.memory_space<vmem>>, vector<1x32x128xbf16>
    %147 = vector.shape_cast %146 : vector<1x32x128xbf16> to vector<32x128xbf16>
    %cst_52 = arith.constant dense<0.000000e+00> : vector<32x128xf32>
    %148 = tpu.matmul %145, %147, %cst_52 {dimension_numbers = #tpu.dot_dimension_numbers<[1], [0], [0], [1], [0, 0, 1, 1], [], []>} : vector<32x32xbf16>, vector<32x128xbf16>, vector<32x128xf32> -> vector<32x128xf32>
    %c0_53 = arith.constant 0 : index
    %c0_54 = arith.constant 0 : index
    %c0_55 = arith.constant 0 : index
    %149 = vector.load %arg12[%c0_53, %c0_54, %c0_55] : memref<1x1x128xf32, #tpu.memory_space<vmem>>, vector<1x1x128xf32>
    %150 = vector.shape_cast %149 : vector<1x1x128xf32> to vector<128xf32>
    %151 = vector.shape_cast %150 : vector<128xf32> to vector<1x128xf32>
    %152 = vector.broadcast %151 : vector<1x128xf32> to vector<32x128xf32>
    %153 = arith.addf %148, %152 : vector<32x128xf32>
    %cst_56 = arith.constant 1.702000e+00 : f32
    %154 = vector.broadcast %cst_56 : f32 to vector<32x128xf32>
    %155 = arith.mulf %154, %153 : vector<32x128xf32>
    %156 = arith.negf %155 : vector<32x128xf32>
    %157 = math.exp %156 : vector<32x128xf32>
    %cst_57 = arith.constant 1.000000e+00 : f32
    %158 = vector.broadcast %cst_57 : f32 to vector<32x128xf32>
    %159 = arith.addf %158, %157 : vector<32x128xf32>
    %160 = arith.divf %158, %159 : vector<32x128xf32>
    %161 = arith.mulf %153, %160 : vector<32x128xf32>
    %162 = arith.truncf %161 : vector<32x128xf32> to vector<32x128xbf16>
    %c0_58 = arith.constant 0 : index
    %c0_59 = arith.constant 0 : index
    %c0_60 = arith.constant 0 : index
    %163 = vector.load %arg13[%c0_58, %c0_59, %c0_60] : memref<1x128x32xbf16, #tpu.memory_space<vmem>>, vector<1x128x32xbf16>
    %164 = vector.shape_cast %163 : vector<1x128x32xbf16> to vector<128x32xbf16>
    %cst_61 = arith.constant dense<0.000000e+00> : vector<32x32xf32>
    %165 = tpu.matmul %162, %164, %cst_61 {dimension_numbers = #tpu.dot_dimension_numbers<[1], [0], [0], [1], [0, 0, 1, 1], [], []>} : vector<32x128xbf16>, vector<128x32xbf16>, vector<32x32xf32> -> vector<32x32xf32>
    %c0_62 = arith.constant 0 : index
    %c0_63 = arith.constant 0 : index
    %c0_64 = arith.constant 0 : index
    %166 = vector.load %arg14[%c0_62, %c0_63, %c0_64] : memref<1x1x32xf32, #tpu.memory_space<vmem>>, vector<1x1x32xf32>
    %167 = vector.shape_cast %166 : vector<1x1x32xf32> to vector<32xf32>
    %168 = vector.shape_cast %167 : vector<32xf32> to vector<1x32xf32>
    %169 = vector.broadcast %168 : vector<1x32xf32> to vector<32x32xf32>
    %170 = arith.addf %165, %169 : vector<32x32xf32>
    %171 = vector.shape_cast %170 : vector<32x32xf32> to vector<2x16x32xf32>
    %172 = arith.addf %115, %171 : vector<2x16x32xf32>
    %c0_65 = arith.constant 0 : index
    %c0_66 = arith.constant 0 : index
    %c0_67 = arith.constant 0 : index
    %173 = vector.load %arg16[%c0_65, %c0_66, %c0_67] : memref<2x16x32xf32, #tpu.memory_space<vmem>>, vector<2x16x32xf32>
    tpu.vector_store %arg16[%c0_65, %c0_66, %c0_67], %172 {strides = array<i32>} : memref<2x16x32xf32, #tpu.memory_space<vmem>>, vector<2x16x32xf32>,
    %c1_i32 = arith.constant 1 : i32
    %174 = arith.cmpi eq, %arg1, %c1_i32 : i32
    %175 = arith.extui %174 : i1 to i32
    %c0_i32_68 = arith.constant 0 : i32
    %176 = arith.cmpi ne, %175, %c0_i32_68 : i32
    scf.if %176 {
      %c0_69 = arith.constant 0 : index
      %c0_70 = arith.constant 0 : index
      %c0_71 = arith.constant 0 : index
      %177 = vector.load %arg15[%c0_69, %c0_70, %c0_71] : memref<2x16x32xf32, #tpu.memory_space<vmem>>, vector<2x16x32xf32>
      tpu.vector_store %arg15[%c0_69, %c0_70, %c0_71], %172 {strides = array<i32>} : memref<2x16x32xf32, #tpu.memory_space<vmem>>, vector<2x16x32xf32>,
    } else {
    }
    return
  }
  func.func @transform_0(%arg0: i32, %arg1: i32) -> (i32, i32, i32) {
    %c0_i32 = arith.constant 0 : i32
    %c0_i32_0 = arith.constant 0 : i32
    %c0_i32_1 = arith.constant 0 : i32
    return %arg0, %c0_i32, %c0_i32_0 : i32, i32, i32
  }
  func.func @transform_1(%arg0: i32, %arg1: i32) -> (i32, i32, i32) {
    %c0_i32 = arith.constant 0 : i32
    %c0_i32_0 = arith.constant 0 : i32
    %c0_i32_1 = arith.constant 0 : i32
    return %arg1, %c0_i32, %c0_i32_0 : i32, i32, i32
  }
  func.func @transform_2(%arg0: i32, %arg1: i32) -> (i32, i32, i32) {
    %c0_i32 = arith.constant 0 : i32
    %c0_i32_0 = arith.constant 0 : i32
    %c0_i32_1 = arith.constant 0 : i32
    return %arg1, %c0_i32, %c0_i32_0 : i32, i32, i32
  }
  func.func @transform_3(%arg0: i32, %arg1: i32) -> (i32, i32, i32) {
    %c0_i32 = arith.constant 0 : i32
    %c0_i32_0 = arith.constant 0 : i32
    %c0_i32_1 = arith.constant 0 : i32
    return %arg1, %c0_i32, %c0_i32_0 : i32, i32, i32
  }
  func.func @transform_4(%arg0: i32, %arg1: i32) -> (i32, i32, i32) {
    %c0_i32 = arith.constant 0 : i32
    %c0_i32_0 = arith.constant 0 : i32
    %c0_i32_1 = arith.constant 0 : i32
    return %arg1, %c0_i32, %c0_i32_0 : i32, i32, i32
  }
  func.func @transform_5(%arg0: i32, %arg1: i32) -> (i32, i32, i32) {
    %c0_i32 = arith.constant 0 : i32
    %c0_i32_0 = arith.constant 0 : i32
    %c0_i32_1 = arith.constant 0 : i32
    return %arg1, %c0_i32, %c0_i32_0 : i32, i32, i32
  }
  func.func @transform_6(%arg0: i32, %arg1: i32) -> (i32, i32, i32) {
    %c0_i32 = arith.constant 0 : i32
    %c0_i32_0 = arith.constant 0 : i32
    %c0_i32_1 = arith.constant 0 : i32
    return %arg1, %c0_i32, %c0_i32_0 : i32, i32, i32
  }
  func.func @transform_7(%arg0: i32, %arg1: i32) -> (i32, i32, i32) {
    %c0_i32 = arith.constant 0 : i32
    %c0_i32_0 = arith.constant 0 : i32
    %c0_i32_1 = arith.constant 0 : i32
    return %arg1, %c0_i32, %c0_i32_0 : i32, i32, i32
  }
  func.func @transform_8(%arg0: i32, %arg1: i32) -> (i32, i32, i32) {
    %c0_i32 = arith.constant 0 : i32
    %c0_i32_0 = arith.constant 0 : i32
    %c0_i32_1 = arith.constant 0 : i32
    return %arg1, %c0_i32, %c0_i32_0 : i32, i32, i32
  }
  func.func @transform_9(%arg0: i32, %arg1: i32) -> (i32, i32, i32) {
    %c0_i32 = arith.constant 0 : i32
    %c0_i32_0 = arith.constant 0 : i32
    %c0_i32_1 = arith.constant 0 : i32
    return %arg1, %c0_i32, %c0_i32_0 : i32, i32, i32
  }
  func.func @transform_10(%arg0: i32, %arg1: i32) -> (i32, i32, i32) {
    %c0_i32 = arith.constant 0 : i32
    %c0_i32_0 = arith.constant 0 : i32
    %c0_i32_1 = arith.constant 0 : i32
    return %arg1, %c0_i32, %c0_i32_0 : i32, i32, i32
  }
  func.func @transform_11(%arg0: i32, %arg1: i32) -> (i32, i32, i32) {
    %c0_i32 = arith.constant 0 : i32
    %c0_i32_0 = arith.constant 0 : i32
    %c0_i32_1 = arith.constant 0 : i32
    return %arg1, %c0_i32, %c0_i32_0 : i32, i32, i32
  }
  func.func @transform_12(%arg0: i32, %arg1: i32) -> (i32, i32, i32) {
    %c0_i32 = arith.constant 0 : i32
    %c0_i32_0 = arith.constant 0 : i32
    %c0_i32_1 = arith.constant 0 : i32
    return %arg1, %c0_i32, %c0_i32_0 : i32, i32, i32
  }
  func.func @transform_13(%arg0: i32, %arg1: i32) -> (i32, i32, i32) {
    %c0_i32 = arith.constant 0 : i32
    %c0_i32_0 = arith.constant 0 : i32
    %c0_i32_1 = arith.constant 0 : i32
    return %arg0, %c0_i32, %c0_i32_0 : i32, i32, i32
  }
}

</mosaic_0001>

<bundles_post_ra>
// kernel: tpu_custom_call.1
= control target key start
LH: loop header
LB: loop body
LE: loop exit
PB: predicated region body
PF: predicated region fallthrough
CT: control target
= control target key end

     0   :  { %s6053_s0 = inlined_call_operand.vmem [shape: f32[2,16,32], index: 0, kind: input, shape index: {}]   ;;  %s6054_s1 = inlined_call_operand.vmem [shape: f32[2,1,32], index: 1, kind: input, shape index: {}]   ;;  %s6055_s2 = inlined_call_operand.vmem [shape: f32[2,1,32], index: 2, kind: input, shape index: {}]   ;;  %s6056_s3 = inlined_call_operand.vmem [shape: bf16[2,32,96], index: 3, kind: input, shape index: {}]   ;;  %s6057_s4 = inlined_call_operand.vmem [shape: f32[2,1,96], index: 4, kind: input, shape index: {}]   ;;  %s6058_s5 = inlined_call_operand.vmem [shape: bf16[2,32,32], index: 5, kind: input, shape index: {}]   ;;  %s6059_s6 = inlined_call_operand.vmem [shape: f32[2,1,32], index: 6, kind: input, shape index: {}]   ;;  %s6060_s7 = inlined_call_operand.vmem [shape: f32[2,1,32], index: 7, kind: input, shape index: {}]   ;;  %s6061_s8 = inlined_call_operand.vmem [shape: f32[2,1,32], index: 8, kind: input, shape index: {}]   ;;  %s6062_s9 = inlined_call_operand.vmem [shape: bf16[2,32,128], index: 9, kind: input, shape index: {}]   ;;  %s6063_s10 = inlined_call_operand.vmem [shape: f32[2,1,128], index: 10, kind: input, shape index: {}]   ;;  %s6064_s11 = inlined_call_operand.vmem [shape: bf16[2,128,32], index: 11, kind: input, shape index: {}]   ;;  %s6065_s12 = inlined_call_operand.vmem [shape: f32[2,1,32], index: 12, kind: input, shape index: {}]   ;;  %s6066_s13 = inlined_call_operand.hbm [shape: f32[2,16,32], index: 13, kind: output, shape index: {}]  }
   0x1   :  { %6070 = sst [smem:[#allocation10_spill]] %s6056_s3 }
   0x2   :  { %6071 = sst [smem:[#allocation11_spill]] %s6058_s5 }
   0x3   :  { %6072 = sst [smem:[#allocation12_spill]] %s6066_s13 }
   0x4   :  { %18 = vsyncpa [#allocation4], 0  ;;  %s5193_s25 = smov 0   ;;  %s5195_s26 = smov 0  }
   0x5   :  { %s5197_s27 = smov 0  }
   0x6 LB: > { %6073 = sst [smem:[#allocation6_spill]] %s5102_s26  ;;  %s33_s29 = sadd.s32 1, %s5102_s26  ;;  %s5106_s27 = sphi %s5197_s27, %s24_s27   ;;  %s5102_s26 = sphi %s5195_s26, %s6090_s26   ;;  %s5098_s25 = sphi %s5193_s25, %s6089_s25  }
   0x7   : > { %6074 = sst [smem:[#allocation7_spill]] %s5106_s27  ;;  %p34_p0 = scmp.ge.s32.totalorder %s33_s29, 2 }
   0x8   : > { %p4574_p1 = scmp.ge.s32.totalorder %s5106_s27, 1  ;;  %p506_p2 = scmp.lt.s32.totalorder %s5106_s27, 3 }
   0x9   : > { %s6092_s29 = smov (%p34_p0, %s33_s29), 0 }
   0xa   : > { %6075 = sst [smem:[#allocation8_spill]] %s6092_s29  ;;  %p507_p3 = pnand %p4574_p1, %p506_p2 }
   0xc   : > { %510 = sbr.rel (%p507_p3) target bundleno = 3284 (0xcd4), region = 72 }
  0x11   : > { %p597_p4 = scmp.lt.s32.totalorder %s5098_s25, 1  ;;  %s6076_s3 = sld [smem:[#allocation10_spill]] }
  0x12   : > { %s6077_s5 = sld [smem:[#allocation11_spill]]  ;;  %p4583_p5 = scmp.ne.s32.totalorder %s5098_s25, 0 }
  0x13   : > { %s5216_s30 = scalar_select %p597_p4, %s5098_s25, 1 }
  0x15   : > { %s4669_s20 = sshll.u32 %s5216_s30, 4  ;;  %s621_s27 = scalar_lea.vmem %s6060_s7, %s5216_s30 }
  0x16   : > { %s624_s23 = scalar_lea.vmem %s6061_s8, %s5216_s30  ;;  %s640_s21 = scalar_lea.vmem %s6065_s12, %s5216_s30 }
  0x17   : > { %s5234_s15 = scalar_lea.vmem %s6076_s3, %s4669_s20  ;;  %s5256_s3 = scalar_lea.vmem %s6062_s9, %s4669_s20 }
  0x18   : > { %s5239_s26 = scalar_lea.vmem %s6077_s5, %s4669_s20  ;;  %s632_s5 = scalar_lea.vmem %s6063_s10, %s5216_s30 }
  0x19   : > { %6078 = sst [smem:[#allocation9_spill]] %s5239_s26  ;;  %s4672_s26 = sshll.u32 %s5216_s30, 6 }
  0x1a   : > { %s5266_s17 = scalar_lea.vmem %s6064_s11, %s4672_s26  ;;  %646 = sbr.rel (%p4583_p5) target bundleno = 34 (0x22), region = 76 }
  0x1f   : > { %v647_v0 = vld [vmem:[%s6053_s0] sm:$0xff]  ;;  %vm651_vm0 = vcmask 261120   ;;  %v648_v1 = vld [vmem:[%s6053_s0 + $0x8] sm:$0xff]  ;;  %v649_v2 = vld [vmem:[%s6053_s0 + $0x10] sm:$0xff] }
  0x20   : > { %652 = vst.msk [vmem:[#allocation2] sm:$0xff] %vm651_vm0, %v647_v0  ;;  %653 = vst.msk [vmem:[#allocation2 + $0x8] sm:$0xff] %vm651_vm0, %v648_v1  ;;  %v650_v3 = vld [vmem:[%s6053_s0 + $0x18] sm:$0xff] }
  0x21   : > { %654 = vst.msk [vmem:[#allocation2 + $0x10] sm:$0xff] %vm651_vm0, %v649_v2  ;;  %655 = vst.msk [vmem:[#allocation2 + $0x18] sm:$0xff] %vm651_vm0, %v650_v3 }
  0x22 PF: > { %vm662_vm1 = vcmask 261120   ;;  %v4942_v32 = vld [vmem:[%s5234_s15 + $0x8] sm:$0xff]   ;;  %v4943_v33 = vld [vmem:[%s5234_s15] sm:$0xff]   ;;  %s6079_s19 = scalar_lea.vmem %s6054_s1, %s5216_s30  ;;  %s6080_s20 = scalar_lea.vmem %s6055_s2, %s5216_s30  ;;  %vm5113_vm2 = vmmov 0   ;;  %vm1630_vm3 = vcmask 64512   ;;  %vm1830_vm5 = vcmask 130048  }
  0x23   : > { %4727 = vmatprep.subr.bf16.mxu0 %v4942_v32  ;;  %v4584_v48 = vld [vmem:[%s6079_s19] ss:$0 sm:$0xff]  ;;  %s6081_s28 = scalar_lea.vmem %s6057_s4, %s5216_s30  ;;  %s5108_s29 = smov 112   ;;  %vm2399_vm6 = vcmask 195584  }
  0x24   : > { %4728 = vmatpush3.bf16.msra.mxu0 %v4942_v32  ;;  %v4585_v53 = vld [vmem:[%s6080_s20] ss:$0 sm:$0xff]  ;;  %s5109_s26 = smov 120   ;;  %s5110_s13 = smov 104  }
  0x25   : > { %4729 = vmatprep.subr.bf16.mxu0 %v4943_v33  ;;  %v4586_v2 = vld [vmem:[%s6081_s28] ss:$0 sm:$0xff]  ;;  %s5111_s15 = smov 96   ;;  %s5117_s16 = smov 64  }
  0x26   : > { %s5118_s19 = smov 16   ;;  %s5119_s18 = smov 24  }
  0x27   : > { %v656_v4 = vld [vmem:[#allocation2] sm:$0xff]  ;;  %v657_v6 = vld [vmem:[#allocation2 + $0x8] sm:$0xff]  ;;  %s5120_s22 = smov 8   ;;  %s6082_s20 = sld [smem:[#allocation9_spill]] }
  0x28   : > { %v658_v5 = vld [vmem:[#allocation2 + $0x10] sm:$0xff]  ;;  %v663_v7 = vsel %vm662_vm1, %v656_v4, 0.0  ;;  %v659_v9 = vld [vmem:[#allocation2 + $0x18] sm:$0xff]  ;;  %v666_v10 = vsel %vm662_vm1, %v657_v6, 0.0  ;;  %4730 = vmatpush3.bf16.msra.mxu0 %v4943_v33  ;;  %s6083_s28 = scalar_lea.vmem %s6059_s6, %s5216_s30  ;;  %p4664_p6 = scmp.ne.s32.totalorder %s5098_s25, 1 }
  0x29   : > { %v669_v8 = vsel %vm662_vm1, %v658_v5, 0.0  ;;  %664 = vadd.xlane.f32.xlu0 %v663_v7  ;;  %v672_v11 = vsel %vm662_vm1, %v659_v9, 0.0 }
  0x2a   : > { %670 = vadd.xlane.f32.xlu1 %v669_v8 }
  0x2d   : > { %667 = vadd.xlane.f32.xlu0 %v666_v10 }
  0x2e   : > { %673 = vadd.xlane.f32.xlu1 %v672_v11 }
  0xb2   : > { %v665_v12 = vpop.xlane.xlu0 %664 }
  0xb3   : > { %v671_v13 = vpop.xlane.xlu1 %670  ;;  %v676_v14 = vmul.f32 0.03125, %v665_v12 }
  0xb4   : > { %v678_v15 = vmul.f32 0.03125, %v671_v13 }
  0xb5   : > { %v680_v16 = vsub.f32 %v656_v4, %v676_v14 }
  0xb6   : > { %v682_v17 = vsub.f32 %v658_v5, %v678_v15  ;;  %v668_v18 = vpop.xlane.xlu0 %667 }
  0xb7   : > { %v674_v19 = vpop.xlane.xlu1 %673  ;;  %v677_v20 = vmul.f32 0.03125, %v668_v18  ;;  %v684_v22 = vmul.f32 %v680_v16, %v680_v16 }
  0xb8   : > { %v679_v21 = vmul.f32 0.03125, %v674_v19  ;;  %v686_v23 = vmul.f32 %v682_v17, %v682_v17  ;;  %v850_v19 = vlaneseq }
  0xb9   : > { %v681_v24 = vsub.f32 %v657_v6, %v677_v20  ;;  %v688_v26 = vsel %vm662_vm1, %v684_v22, 0.0 }
  0xba   : > { %v683_v25 = vsub.f32 %v659_v9, %v679_v21  ;;  %689 = vadd.xlane.f32.xlu0 %v688_v26  ;;  %v694_v27 = vsel %vm662_vm1, %v686_v23, 0.0 }
  0xbb   : > { %v685_v28 = vmul.f32 %v681_v24, %v681_v24 }
  0xbc   : > { %v687_v29 = vmul.f32 %v683_v25, %v683_v25 }
  0xbd   : > { %v691_v30 = vsel %vm662_vm1, %v685_v28, 0.0 }
  0xbe   : > { %695 = vadd.xlane.f32.xlu0 %v694_v27  ;;  %692 = vadd.xlane.f32.xlu1 %v691_v30  ;;  %v697_v31 = vsel %vm662_vm1, %v687_v29, 0.0  ;;  %v5115_v29 = vmov 0  }
  0xbf   : > { %v5346_v30 = vpack.i.b16 %v5115_v29, %v5115_v29 }
  0xc2   : > { %698 = vadd.xlane.f32.xlu1 %v697_v31 }
 0x143   : > { %v690_v34 = vpop.xlane.xlu0 %689 }
 0x144   : > { %v700_v35 = vmul.f32 0.03125, %v690_v34  ;;  %v5116_v34 = vmov 1934713408  }
 0x146   : > { %v704_v36 = vadd.f32 1e-05, %v700_v35  ;;  %v879_v35 = vunpack.c.l.s4 %v5116_v34 }
 0x147   : > { %v693_v37 = vpop.xlane.xlu1 %692  ;;  %v696_v38 = vpop.xlane.xlu0 %695 }
 0x148   : > { %4956 = vrsqrt.f32 %v704_v36  ;;  %v701_v39 = vmul.f32 0.03125, %v693_v37  ;;  %v702_v40 = vmul.f32 0.03125, %v696_v38 }
 0x14a   : > { %v705_v41 = vadd.f32 1e-05, %v701_v39  ;;  %v706_v42 = vadd.f32 1e-05, %v702_v40 }
 0x14b   : > { %v699_v43 = vpop.xlane.xlu1 %698 }
 0x14c   : > { %4958 = vrsqrt.f32 %v705_v41  ;;  %v703_v44 = vmul.f32 0.03125, %v699_v43 }
 0x14d   : > { %4960 = vrsqrt.f32 %v706_v42 }
 0x14e   : > { %v707_v45 = vadd.f32 1e-05, %v703_v44 }
 0x150   : > { %4962 = vrsqrt.f32 %v707_v45 }
 0x155   : > { %v4957_v46 = vpop.eup %4956 }
 0x156   : > { %v712_v47 = vmul.f32 %v4957_v46, %v680_v16  ;;  %v5112_v16 = vmov 0.0  }
 0x157   : > { %4735 = vmatprep.subr.bf16.mxu0 %v5112_v16  ;;  %4747 = vmatprep.subr.bf16.mxu1 %v5112_v16 }
 0x158   : > { %v722_v52 = vmul.f32 %v4584_v48, %v712_v47  ;;  %4749 = vmatprep.mubr.msk.bf16.mxu1 %vm5113_vm2, %v5112_v16 }
 0x159   : > { %v4959_v49 = vpop.eup %4958 }
 0x15a   : > { %v4961_v50 = vpop.eup %4960  ;;  %v713_v51 = vmul.f32 %v4959_v49, %v681_v24  ;;  %v732_v57 = vadd.f32 %v4585_v53, %v722_v52 }
 0x15b   : > { %v714_v54 = vmul.f32 %v4961_v50, %v682_v17  ;;  %v5114_v17 = vmov 1983009808   ;;  %v880_v50 = vunpack.c.0.s8 %v879_v35 }
 0x15c   : > { %v723_v55 = vmul.f32 %v4584_v48, %v713_v51  ;;  %v848_v18 = vunpack.c.l.s4 %v5114_v17 }
 0x15d   : > { %v4963_v56 = vpop.eup %4962  ;;  %v724_v60 = vmul.f32 %v4584_v48, %v714_v54 }
 0x15e   : > { %v733_v58 = vadd.f32 %v4585_v53, %v723_v55  ;;  %v715_v59 = vmul.f32 %v4963_v56, %v683_v25  ;;  %v849_v23 = vunpack.c.0.s8 %v848_v18  ;;  %v851_v25 = vshrl.u32 %v850_v19, 7 }
 0x15f   : > { %v734_v63 = vadd.f32 %v4585_v53, %v724_v60 }
 0x160   : > { %v736_v61 = vpack.c.bf16 %v733_v58, %v732_v57  ;;  %v725_v62 = vmul.f32 %v4584_v48, %v715_v59  ;;  %v5351_v42 = vsub.s32 %v849_v23, %v851_v25 }
 0x162   : > { %4731 = vmatprep.mubr.msk.bf16.mxu0 %vm662_vm1, %v736_v61  ;;  %v735_v0 = vadd.f32 %v4585_v53, %v725_v62 }
 0x164   : > { %v737_v1 = vpack.c.bf16 %v735_v0, %v734_v63 }
 0x166   : > { %4732 = vmatmul.mubr.msk.bf16.vlgmr.msra.gmra.mxu0 %vm662_vm1, %v737_v1  ;;  %v5370_v1 = vsub.s32 %v880_v50, %v851_v25 }
 0x167   : > { %4737 = vmatprep.mubr.msk.bf16.mxu0 %vm5113_vm2, %v5112_v16 }
 0x226   : > { %v4733_v3 = vpop.f32.mrf.mxu0 }
 0x227   : > { %v810_v4 = vadd.f32 %v4733_v3, %v4586_v2 }
 0x228   : > { %v801_v5 = vpop.f32.mrf.mxu0 }
 0x229   : > { %v802_v9 = vadd.f32 %v4586_v2, %v801_v5 }
 0x22a   : > { %v4734_v6 = vpop.f32.mrf.mxu0 }
 0x22b   : > { %v813_v7 = vadd.f32 %v4734_v6, %v4586_v2 }
 0x22c   : > { %v804_v8 = vpop.f32.mrf.mxu0 }
 0x22d   : > { %v5312_v10 = vpack.c.bf16 %v813_v7, %v810_v4  ;;  %v805_v11 = vadd.f32 %v4586_v2, %v804_v8 }
 0x22f   : > { %v5314_v12 = vpack.c.bf16 %v805_v11, %v802_v9 }
 0x231   : > { %820 = vrot.lane.b32.xlu1 %v5314_v12, %s5108_s29  ;;  %818 = vrot.lane.b32.xlu0 %v5314_v12, %s5109_s26  ;;  %v828_v33 = vshrl.u32 %v5314_v12, 16 }
 0x235   : > { %822 = vrot.lane.b32.xlu1 %v5314_v12, %s5110_s13 }
 0x239   : > { %1090 = vrot.lane.b32.xlu1 %v5314_v12, %s5111_s15 }
 0x2a3   : > { %v5321_v13 = vpop.permute.xlu1 %820  ;;  %v5323_v14 = vpop.permute.xlu0 %818 }
 0x2a4   : > { %1094 = vrot.lane.b32.xlu1 %v5321_v13, %s5111_s15  ;;  %1092 = vrot.lane.b32.xlu0 %v5323_v14, %s5111_s15  ;;  %v836_v24 = vshrl.u32 %v5321_v13, 16  ;;  %v829_v26 = vshrl.u32 %v5323_v14, 16  ;;  %v826_v32 = vpack.i.b16 %v5323_v14, %v5314_v12 }
 0x2a6   : > { %v830_v43 = vpack.i.b16 %v829_v26, %v828_v33  ;;  %v846_v49 = vcombine.high %v826_v32, %v5346_v30  ;;  %v853_v63 = vrot.slane %v826_v32, %v5351_v42 }
 0x2a7   : > { %v5329_v15 = vpop.permute.xlu1 %822 }
 0x2a8   : > { %2404 = vrot.lane.b32.xlu1 %v5312_v10, %s5109_s26  ;;  %1096 = vrot.lane.b32.xlu0 %v5329_v15, %s5111_s15  ;;  %v837_v22 = vshrl.u32 %v5329_v15, 16  ;;  %v834_v45 = vpack.i.b16 %v5329_v15, %v5321_v13  ;;  %v912_v56 = vcombine.high %v830_v43, %v5346_v30  ;;  %v860_v0 = vrot.slane %v846_v49, %v5351_v42 }
 0x2aa   : > { %v838_v36 = vpack.i.b16 %v837_v22, %v836_v24  ;;  %v861_v57 = vcombine.high %v834_v45, %v5346_v30  ;;  %v926_v7 = vrot.slane %v912_v56, %v5351_v42  ;;  %v919_v22 = vrot.slane %v830_v43, %v5351_v42 }
 0x2ab   : > { %v1091_v20 = vpop.permute.xlu1 %1090  ;;  %v868_v23 = vrot.slane %v834_v45, %v5351_v42 }
 0x2ac   : > { %2408 = vrot.lane.b32.xlu1 %v5312_v10, %s5110_s13  ;;  %2406 = vrot.lane.b32.xlu0 %v5312_v10, %s5108_s29  ;;  %v1102_v38 = vshrl.u32 %v1091_v20, 16  ;;  %v927_v51 = vcombine.high %v838_v36, %v5346_v30  ;;  %v875_v8 = vrot.slane %v861_v57, %v5351_v42  ;;  %v934_v9 = vrot.slane %v838_v36, %v5351_v42 }
 0x2ae   : > { %v941_v2 = vrot.slane %v927_v51, %v5351_v42  ;;  %v893_v32 = vcombine.high %v860_v0, %v875_v8  ;;  %v942_v33 = vcombine.low %v919_v22, %v934_v9  ;;  %v943_v34 = vcombine.high %v919_v22, %v934_v9 }
 0x2b0   : > { %v958_v24 = vcombine.low %v926_v7, %v941_v2  ;;  %v959_v25 = vcombine.high %v926_v7, %v941_v2  ;;  %v907_v49 = vrot.slane %v893_v32, %v5370_v1  ;;  %v950_v50 = vrot.slane %v942_v33, %v5370_v1 }
 0x2b1   : > { %v957_v51 = vrot.slane %v943_v34, %v5370_v1 }
 0x2b2   : > { %v973_v43 = vrot.slane %v959_v25, %v5370_v1 }
 0x316   : > { %v1093_v21 = vpop.permute.xlu0 %1092  ;;  %v1095_v27 = vpop.permute.xlu1 %1094 }
 0x317   : > { %v1100_v28 = vpack.i.b16 %v1093_v21, %v1091_v20  ;;  %v1103_v31 = vshrl.u32 %v1093_v21, 16  ;;  %v1110_v39 = vshrl.u32 %v1095_v27, 16 }
 0x319   : > { %v1114_v44 = vcombine.high %v1100_v28, %v5346_v30  ;;  %v1104_v46 = vpack.i.b16 %v1103_v31, %v1102_v38  ;;  %v1121_v59 = vrot.slane %v1100_v28, %v5351_v42  ;;  %v892_v31 = vcombine.low %v860_v0, %v875_v8 }
 0x31a   : > { %v1097_v37 = vpop.permute.xlu0 %1096 }
 0x31b   : > { %v1108_v40 = vpack.i.b16 %v1097_v37, %v1095_v27  ;;  %v1111_v41 = vshrl.u32 %v1097_v37, 16  ;;  %v1128_v53 = vrot.slane %v1114_v44, %v5351_v42  ;;  %v1180_v58 = vcombine.high %v1104_v46, %v5346_v30 }
 0x31c   : > { %v1187_v3 = vrot.slane %v1104_v46, %v5351_v42 }
 0x31d   : > { %v1112_v47 = vpack.i.b16 %v1111_v41, %v1110_v39  ;;  %v1129_v48 = vcombine.high %v1108_v40, %v5346_v30  ;;  %v1136_v54 = vrot.slane %v1108_v40, %v5351_v42  ;;  %v1194_v11 = vrot.slane %v1180_v58, %v5351_v42 }
 0x31e   : > { %v876_v39 = vcombine.low %v853_v63, %v868_v23  ;;  %v877_v40 = vcombine.high %v853_v63, %v868_v23  ;;  %v966_v41 = vrot.slane %v958_v24, %v5370_v1 }
 0x31f   : > { %v1143_v52 = vrot.slane %v1129_v48, %v5351_v42  ;;  %v1195_v55 = vcombine.high %v1112_v47, %v5346_v30  ;;  %v1202_v62 = vrot.slane %v1112_v47, %v5351_v42  ;;  %v1144_v4 = vcombine.low %v1121_v59, %v1136_v54 }
 0x320   : > { %v1145_v5 = vcombine.high %v1121_v59, %v1136_v54  ;;  %v900_v48 = vrot.slane %v892_v31, %v5370_v1  ;;  %v884_v56 = vrot.slane %v876_v39, %v5370_v1  ;;  %v891_v57 = vrot.slane %v877_v40, %v5370_v1 }
 0x321   : > { %v1160_v60 = vcombine.low %v1128_v53, %v1143_v52  ;;  %v1161_v61 = vcombine.high %v1128_v53, %v1143_v52  ;;  %v1209_v6 = vrot.slane %v1195_v55, %v5351_v42  ;;  %v1210_v20 = vcombine.low %v1187_v3, %v1202_v62 }
 0x322   : > { %v1211_v21 = vcombine.high %v1187_v3, %v1202_v62  ;;  %v1152_v26 = vrot.slane %v1144_v4, %v5370_v1  ;;  %v1159_v27 = vrot.slane %v1145_v5, %v5370_v1  ;;  %v1044_v58 = vcombine.low %v966_v41, %v973_v43 }
 0x323   : > { %v1168_v17 = vrot.slane %v1160_v60, %v5370_v1  ;;  %v1175_v18 = vrot.slane %v1161_v61, %v5370_v1  ;;  %v1226_v28 = vcombine.low %v1194_v11, %v1209_v6  ;;  %v1227_v29 = vcombine.high %v1194_v11, %v1209_v6 }
 0x324   : > { %v1218_v35 = vrot.slane %v1210_v20, %v5370_v1  ;;  %v1225_v36 = vrot.slane %v1211_v21, %v5370_v1  ;;  %v1246_v46 = vcombine.low %v1152_v26, %v1159_v27  ;;  %v4595_v47 = vcombine.high %v1152_v26, %v1159_v27 }
 0x325   : > { %v1262_v37 = vcombine.low %v1168_v17, %v1175_v18  ;;  %v4596_v38 = vcombine.high %v1168_v17, %v1175_v18  ;;  %v1234_v44 = vrot.slane %v1226_v28, %v5370_v1  ;;  %v1241_v45 = vrot.slane %v1227_v29, %v5370_v1 }
 0x326   : > { %v1296_v52 = vcombine.low %v1218_v35, %v1225_v36  ;;  %v4597_v53 = vcombine.high %v1218_v35, %v1225_v36  ;;  %v4594_v59 = vcombine.high %v966_v41, %v973_v43  ;;  %v1253_v60 = vrot.slane %v1246_v46, %v5351_v42 }
 0x327   : > { %v1269_v54 = vrot.slane %v1262_v37, %v5351_v42  ;;  %v1277_v55 = vrot.slane %v4596_v38, %v5351_v42  ;;  %v1261_v61 = vrot.slane %v4595_v47, %v5351_v42  ;;  %v1312_v62 = vcombine.low %v1234_v44, %v1241_v45 }
 0x328   : > { %v4598_v63 = vcombine.high %v1234_v44, %v1241_v45  ;;  %v994_v0 = vcombine.low %v900_v48, %v907_v49  ;;  %v4592_v2 = vcombine.high %v900_v48, %v907_v49  ;;  %v1028_v3 = vcombine.low %v950_v50, %v957_v51 }
 0x329   : > { %v4593_v4 = vcombine.high %v950_v50, %v957_v51  ;;  %v1286_v5 = vcombine.low %v1269_v54, %v1277_v55  ;;  %v1303_v6 = vrot.slane %v1296_v52, %v5351_v42  ;;  %v1311_v7 = vrot.slane %v4597_v53, %v5351_v42 }
 0x32a   : > { %v978_v8 = vcombine.low %v884_v56, %v891_v57  ;;  %v4591_v9 = vcombine.high %v884_v56, %v891_v57  ;;  %v1051_v11 = vrot.slane %v1044_v58, %v5351_v42  ;;  %v1059_v17 = vrot.slane %v4594_v59, %v5351_v42 }
 0x32b   : > { %v1278_v18 = vcombine.low %v1253_v60, %v1261_v61  ;;  %v1319_v20 = vrot.slane %v1312_v62, %v5351_v42  ;;  %v1327_v21 = vrot.slane %v4598_v63, %v5351_v42  ;;  %v1328_v22 = vcombine.low %v1303_v6, %v1311_v7 }
 0x32c   : > { %v1001_v23 = vrot.slane %v994_v0, %v5351_v42  ;;  %v1009_v24 = vrot.slane %v4592_v2, %v5351_v42  ;;  %v1035_v25 = vrot.slane %v1028_v3, %v5351_v42  ;;  %v1043_v26 = vrot.slane %v4593_v4, %v5351_v42 }
 0x32d   : > { %v1293_v27 = vrot.slane %v1286_v5, %v5370_v1  ;;  %v1336_v28 = vcombine.low %v1319_v20, %v1327_v21  ;;  %v985_v29 = vrot.slane %v978_v8, %v5351_v42  ;;  %v993_v31 = vrot.slane %v4591_v9, %v5351_v42 }
 0x32e   : > { %v1285_v32 = vrot.slane %v1278_v18, %v5370_v1  ;;  %v1335_v33 = vrot.slane %v1328_v22, %v5370_v1  ;;  %v1068_v35 = vcombine.low %v1051_v11, %v1059_v17  ;;  %v1018_v36 = vcombine.low %v1001_v23, %v1009_v24 }
 0x32f   : > { %v1343_v34 = vrot.slane %v1336_v28, %v5370_v1  ;;  %v1060_v37 = vcombine.low %v1035_v25, %v1043_v26  ;;  %v1010_v43 = vcombine.low %v985_v29, %v993_v31  ;;  %v5442_v9 = vand.u32 127, %v850_v19 }
 0x330   : > { %v1294_v38 = vcombine.low %v1285_v32, %v1293_v27  ;;  %v1295_v40 = vcombine.high %v1285_v32, %v1293_v27  ;;  %v1075_v46 = vrot.slane %v1068_v35, %v5370_v1  ;;  %v1025_v47 = vrot.slane %v1018_v36, %v5370_v1 }
 0x331   : > { %v1344_v39 = vcombine.low %v1335_v33, %v1343_v34  ;;  %v1345_v41 = vcombine.high %v1335_v33, %v1343_v34  ;;  %v1067_v50 = vrot.slane %v1060_v37, %v5370_v1  ;;  %v1017_v52 = vrot.slane %v1010_v43, %v5370_v1 }
 0x332   : > { %v1349_v55 = vshrl.u32 %v1294_v38, 16  ;;  %v1355_v63 = vshrl.u32 %v1295_v40, 16  ;;  %vm1821_vm4 = vcmp.lt.s32.totalorder %v5442_v9, 8 }
 0x333   : > { %v1348_v44 = vpack.i.b16 %v1344_v39, %v1294_v38  ;;  %v1354_v45 = vpack.i.b16 %v1345_v41, %v1295_v40  ;;  %v1350_v51 = vshrl.u32 %v1344_v39, 16  ;;  %v1076_v53 = vcombine.low %v1067_v50, %v1075_v46 }
 0x334   : > { %v1077_v54 = vcombine.high %v1067_v50, %v1075_v46  ;;  %v1026_v56 = vcombine.low %v1017_v52, %v1025_v47  ;;  %v1027_v57 = vcombine.high %v1017_v52, %v1025_v47  ;;  %v1356_v61 = vshrl.u32 %v1345_v41, 16  ;;  %v5477_v50 = vpop.permute.xlu1 %2404  ;;  %v5481_v52 = vpop.permute.xlu0 %2406 }
 0x335   : > { %v1635_v48 = vsel %vm1630_vm3, %v1348_v44, 0  ;;  %v1729_v49 = vsel %vm1630_vm3, %v1354_v45, 0  ;;  %v1351_v58 = vpack.i.b16 %v1350_v51, %v1349_v55  ;;  %v1082_v0 = vshrl.u32 %v1076_v53, 16 }
 0x336   : > { %4736 = vmatpush3.bf16.xpose.msra.mxu0 %v1635_v48  ;;  %4748 = vmatpush3.bf16.xpose.msra.mxu1 %v1729_v49  ;;  %v1080_v59 = vpack.i.b16 %v1076_v53, %v1026_v56  ;;  %v1086_v60 = vpack.i.b16 %v1077_v54, %v1027_v57  ;;  %v1081_v2 = vshrl.u32 %v1026_v56, 16  ;;  %v1357_v3 = vpack.i.b16 %v1356_v61, %v1355_v63 }
 0x337   : > { %4741 = vmatprep.subr.bf16.mxu0 %v5112_v16  ;;  %4759 = vmatprep.subr.bf16.mxu1 %v5112_v16  ;;  %v1682_v62 = vsel %vm1630_vm3, %v1351_v58, 0  ;;  %v1088_v6 = vshrl.u32 %v1077_v54, 16  ;;  %v1087_v7 = vshrl.u32 %v1027_v57, 16 }
 0x338   : > { %v1083_v4 = vpack.i.b16 %v1082_v0, %v1081_v2  ;;  %v1776_v5 = vsel %vm1630_vm3, %v1357_v3, 0  ;;  %v5479_v51 = vpop.permute.xlu1 %2408 }
 0x339   : > { %v1089_v8 = vpack.i.b16 %v1088_v6, %v1087_v7 }
 0x33d   : > { %4738 = vmatmul.mubr.msk.bf16.vlgmr.msra.gmra.mxu0 %vm1630_vm3, %v1080_v59  ;;  %4750 = vmatmul.mubr.msk.bf16.vlgmr.msra.gmra.mxu1 %vm1630_vm3, %v1086_v60 }
 0x33e   : > { %4742 = vmatpush3.bf16.xpose.msra.mxu0 %v1682_v62  ;;  %4743 = vmatprep.mubr.msk.bf16.mxu0 %vm5113_vm2, %v5112_v16 }
 0x33f   : > { %4753 = vmatprep.subr.bf16.mxu0 %v5112_v16  ;;  %4761 = vmatprep.mubr.msk.bf16.mxu1 %vm5113_vm2, %v5112_v16 }
 0x345   : > { %4744 = vmatmul.mubr.msk.bf16.vlgmr.msra.gmra.mxu0 %vm1630_vm3, %v1083_v4 }
 0x346   : > { %4754 = vmatpush3.bf16.xpose.msra.mxu0 %v1776_v5  ;;  %4755 = vmatprep.mubr.msk.bf16.mxu0 %vm5113_vm2, %v5112_v16 }
 0x347   : > { %4765 = vmatprep.subr.bf16.mxu0 %v5112_v16 }
 0x34d   : > { %4756 = vmatmul.mubr.msk.bf16.vlgmr.msra.gmra.mxu0 %vm1630_vm3, %v1089_v8 }
 0x34e   : > { %4767 = vmatprep.mubr.msk.bf16.mxu0 %vm5113_vm2, %v5112_v16 }
 0x3fd   : > { %v1671_v11 = vpop.f32.mrf.mxu0  ;;  %v1765_v17 = vpop.f32.mrf.mxu1 }
 0x3fe   : > { %v1822_v18 = vsel %vm1821_vm4, %v1671_v11, -1e+30  ;;  %v1826_v23 = vsel %vm1821_vm4, %v1765_v17, -1e+30 }
 0x3ff   : > { %v4739_v20 = vpop.f32.mrf.mxu0  ;;  %v4751_v21 = vpop.f32.mrf.mxu1  ;;  %v1831_v22 = vsel %vm1830_vm5, %v1822_v18, -inf  ;;  %v1843_v28 = vsel %vm1830_vm5, %v1826_v23, -inf }
 0x400   : > { %1832 = vmax.xlane.f32.xlu1 %v1831_v22 }
 0x401   : > { %v1674_v24 = vpop.f32.mrf.mxu0  ;;  %v1768_v25 = vpop.f32.mrf.mxu1 }
 0x402   : > { %v1823_v19 = vsel %vm1821_vm4, %v1674_v24, -1e+30  ;;  %v1827_v31 = vsel %vm1821_vm4, %v1768_v25, -1e+30 }
 0x403   : > { %v4740_v26 = vpop.f32.mrf.mxu0  ;;  %v4752_v27 = vpop.f32.mrf.mxu1  ;;  %v1834_v29 = vsel %vm1830_vm5, %v1823_v19, -inf  ;;  %v1846_v34 = vsel %vm1830_vm5, %v1827_v31, -inf }
 0x404   : > { %1844 = vmax.xlane.f32.xlu1 %v1843_v28  ;;  %1835 = vmax.xlane.f32.xlu0 %v1834_v29 }
 0x405   : > { %v1718_v32 = vpop.f32.mrf.mxu0 }
 0x406   : > { %v1824_v35 = vsel %vm1821_vm4, %v1718_v32, -1e+30 }
 0x407   : > { %v4745_v33 = vpop.f32.mrf.mxu0  ;;  %v1837_v38 = vsel %vm1830_vm5, %v1824_v35, -inf }
 0x408   : > { %1847 = vmax.xlane.f32.xlu0 %v1846_v34 }
 0x409   : > { %v1721_v36 = vpop.f32.mrf.mxu0 }
 0x40a   : > { %v1825_v39 = vsel %vm1821_vm4, %v1721_v36, -1e+30 }
 0x40b   : > { %v4746_v37 = vpop.f32.mrf.mxu0  ;;  %v1840_v44 = vsel %vm1830_vm5, %v1825_v39, -inf }
 0x40c   : > { %1838 = vmax.xlane.f32.xlu0 %v1837_v38 }
 0x40d   : > { %v1812_v40 = vpop.f32.mrf.mxu0 }
 0x40e   : > { %v1828_v41 = vsel %vm1821_vm4, %v1812_v40, -1e+30 }
 0x40f   : > { %v4757_v43 = vpop.f32.mrf.mxu0  ;;  %v1849_v45 = vsel %vm1830_vm5, %v1828_v41, -inf }
 0x410   : > { %1841 = vmax.xlane.f32.xlu0 %v1840_v44  ;;  %1850 = vmax.xlane.f32.xlu1 %v1849_v45 }
 0x411   : > { %v1815_v46 = vpop.f32.mrf.mxu0 }
 0x412   : > { %v1829_v47 = vsel %vm1821_vm4, %v1815_v46, -1e+30 }
 0x413   : > { %v4758_v48 = vpop.f32.mrf.mxu0  ;;  %v1852_v49 = vsel %vm1830_vm5, %v1829_v47, -inf }
 0x414   : > { %1853 = vmax.xlane.f32.xlu0 %v1852_v49 }
 0x421   : > { %1360 = vrot.lane.b32.xlu1 %v5323_v14, %s5117_s16 }
 0x425   : > { %1362 = vrot.lane.b32.xlu1 %v5321_v13, %s5117_s16 }
 0x429   : > { %1364 = vrot.lane.b32.xlu1 %v5329_v15, %s5117_s16 }
 0x42a   : > { %1358 = vrot.lane.b32.xlu0 %v5314_v12, %s5117_s16 }
 0x489   : > { %v1833_v53 = vpop.xlane.xlu1 %1832 }
 0x48a   : > { %v1855_v54 = vsub.f32 %v1822_v18, %v1833_v53 }
 0x48c   : > { %v1863_v55 = vmul.f32 1.442695, %v1855_v54 }
 0x48d   : > { %v1845_v56 = vpop.xlane.xlu1 %1844  ;;  %v1836_v14 = vpop.xlane.xlu0 %1835 }
 0x48e   : > { %4964 = vpow2.f32 %v1863_v55  ;;  %v1859_v57 = vsub.f32 %v1826_v23, %v1845_v56  ;;  %v1856_v13 = vsub.f32 %v1823_v19, %v1836_v14 }
 0x490   : > { %v1871_v58 = vmul.f32 1.442695, %v1859_v57  ;;  %v1865_v59 = vmul.f32 1.442695, %v1856_v13 }
 0x491   : > { %v1848_v15 = vpop.xlane.xlu0 %1847 }
 0x492   : > { %4966 = vpow2.f32 %v1871_v58  ;;  %v1860_v60 = vsub.f32 %v1827_v31, %v1848_v15 }
 0x493   : > { %4968 = vpow2.f32 %v1865_v59 }
 0x494   : > { %v1873_v12 = vmul.f32 1.442695, %v1860_v60 }
 0x495   : > { %v1839_v61 = vpop.xlane.xlu0 %1838 }
 0x496   : > { %4970 = vpow2.f32 %v1873_v12  ;;  %v1857_v62 = vsub.f32 %v1824_v35, %v1839_v61 }
 0x498   : > { %v1867_v63 = vmul.f32 1.442695, %v1857_v62 }
 0x499   : > { %v1842_v0 = vpop.xlane.xlu0 %1841  ;;  %v1851_v2 = vpop.xlane.xlu1 %1850 }
 0x49a   : > { %4972 = vpow2.f32 %v1867_v63  ;;  %v1858_v3 = vsub.f32 %v1825_v39, %v1842_v0  ;;  %v1861_v4 = vsub.f32 %v1828_v41, %v1851_v2 }
 0x49b   : > { %v5483_v5 = vpop.eup %4964 }
 0x49c   : > { %v1869_v6 = vmul.f32 1.442695, %v1858_v3  ;;  %v1879_v7 = vsel %vm1830_vm5, %v5483_v5, 0.0  ;;  %v1875_v17 = vmul.f32 1.442695, %v1861_v4 }
 0x49d   : > { %1880 = vadd.xlane.f32.xlu1 %v1879_v7  ;;  %v1361_v8 = vpop.permute.xlu1 %1360  ;;  %v1854_v11 = vpop.xlane.xlu0 %1853 }
 0x49e   : > { %4974 = vpow2.f32 %v1869_v6  ;;  %v1862_v18 = vsub.f32 %v1829_v47, %v1854_v11  ;;  %v1371_v19 = vshrl.u32 %v1361_v8, 16 }
 0x49f   : > { %v5487_v20 = vpop.eup %4966  ;;  %4976 = vpow2.f32 %v1875_v17 }
 0x4a0   : > { %v1877_v21 = vmul.f32 1.442695, %v1862_v18  ;;  %v1891_v22 = vsel %vm1830_vm5, %v5487_v20, 0.0  ;;  %v5491_v23 = vpop.eup %4968 }
 0x4a1   : > { %v1363_v24 = vpop.permute.xlu1 %1362  ;;  %1892 = vadd.xlane.f32.xlu0 %v1891_v22  ;;  %v1359_v25 = vpop.permute.xlu0 %1358  ;;  %v1882_v32 = vsel %vm1830_vm5, %v5491_v23, 0.0 }
 0x4a2   : > { %v1368_v26 = vpack.i.b16 %v1361_v8, %v1359_v25  ;;  %v1370_v27 = vshrl.u32 %v1359_v25, 16  ;;  %4978 = vpow2.f32 %v1877_v21  ;;  %v1378_v37 = vshrl.u32 %v1363_v24, 16 }
 0x4a3   : > { %v5493_v28 = vpop.eup %4970 }
 0x4a4   : > { %v1372_v29 = vpack.i.b16 %v1371_v19, %v1370_v27  ;;  %v1894_v31 = vsel %vm1830_vm5, %v5493_v28, 0.0  ;;  %v1382_v34 = vcombine.high %v1368_v26, %v5346_v30  ;;  %v1389_v40 = vrot.slane %v1368_v26, %v5351_v42 }
 0x4a5   : > { %1895 = vadd.xlane.f32.xlu1 %v1894_v31  ;;  %v1365_v33 = vpop.permute.xlu1 %1364  ;;  %1883 = vadd.xlane.f32.xlu0 %v1882_v32 }
 0x4a6   : > { %v1376_v35 = vpack.i.b16 %v1365_v33, %v1363_v24  ;;  %v1448_v38 = vcombine.high %v1372_v29, %v5346_v30  ;;  %v1379_v39 = vshrl.u32 %v1365_v33, 16  ;;  %v1396_v46 = vrot.slane %v1382_v34, %v5351_v42 }
 0x4a7   : > { %v5500_v36 = vpop.eup %4972  ;;  %v1455_v54 = vrot.slane %v1372_v29, %v5351_v42 }
 0x4a8   : > { %v1397_v41 = vcombine.high %v1376_v35, %v5346_v30  ;;  %v1404_v43 = vrot.slane %v1376_v35, %v5351_v42  ;;  %v1885_v44 = vsel %vm1830_vm5, %v5500_v36, 0.0  ;;  %v1380_v45 = vpack.i.b16 %v1379_v39, %v1378_v37 }
 0x4a9   : > { %1886 = vadd.xlane.f32.xlu0 %v1885_v44  ;;  %v1462_v55 = vrot.slane %v1448_v38, %v5351_v42 }
 0x4aa   : > { %v1411_v47 = vrot.slane %v1397_v41, %v5351_v42  ;;  %v1412_v48 = vcombine.low %v1389_v40, %v1404_v43  ;;  %v1413_v49 = vcombine.high %v1389_v40, %v1404_v43  ;;  %v1463_v56 = vcombine.high %v1380_v45, %v5346_v30 }
 0x4ab   : > { %v5510_v53 = vpop.eup %4974  ;;  %v1470_v14 = vrot.slane %v1380_v45, %v5351_v42 }
 0x4ac   : > { %v1420_v57 = vrot.slane %v1412_v48, %v5370_v1  ;;  %v1427_v13 = vrot.slane %v1413_v49, %v5370_v1  ;;  %v1428_v58 = vcombine.low %v1396_v46, %v1411_v47  ;;  %v1429_v59 = vcombine.high %v1396_v46, %v1411_v47  ;;  %v5523_v3 = vpop.eup %4976 }
 0x4ad   : > { %v1477_v15 = vrot.slane %v1463_v56, %v5351_v42  ;;  %v1478_v60 = vcombine.low %v1455_v54, %v1470_v14  ;;  %v1479_v12 = vcombine.high %v1455_v54, %v1470_v14  ;;  %v1888_v61 = vsel %vm1830_vm5, %v5510_v53, 0.0 }
 0x4ae   : > { %v1436_v62 = vrot.slane %v1428_v58, %v5370_v1  ;;  %v1443_v63 = vrot.slane %v1429_v59, %v5370_v1  ;;  %v1514_v0 = vcombine.low %v1420_v57, %v1427_v13  ;;  %v4599_v2 = vcombine.high %v1420_v57, %v1427_v13  ;;  %1889 = vadd.xlane.f32.xlu1 %v1888_v61 }
 0x4af   : > { %v1486_v4 = vrot.slane %v1478_v60, %v5370_v1  ;;  %v1493_v6 = vrot.slane %v1479_v12, %v5370_v1  ;;  %v1494_v7 = vcombine.low %v1462_v55, %v1477_v15  ;;  %v1495_v8 = vcombine.high %v1462_v55, %v1477_v15  ;;  %v5529_v22 = vpop.eup %4978 }
 0x4b0   : > { %v1521_v11 = vrot.slane %v1514_v0, %v5351_v42  ;;  %v1529_v17 = vrot.slane %v4599_v2, %v5351_v42  ;;  %v1530_v18 = vcombine.low %v1436_v62, %v1443_v63  ;;  %v4600_v21 = vcombine.high %v1436_v62, %v1443_v63 }
 0x4b1   : > { %v1502_v24 = vrot.slane %v1494_v7, %v5370_v1  ;;  %v1509_v25 = vrot.slane %v1495_v8, %v5370_v1  ;;  %v1564_v19 = vcombine.low %v1486_v4, %v1493_v6  ;;  %v4601_v26 = vcombine.high %v1486_v4, %v1493_v6 }
 0x4b2   : > { %v1537_v27 = vrot.slane %v1530_v18, %v5351_v42  ;;  %v1545_v29 = vrot.slane %v4600_v21, %v5351_v42  ;;  %v1897_v31 = vsel %vm1830_vm5, %v5523_v3, 0.0  ;;  %v1900_v37 = vsel %vm1830_vm5, %v5529_v22, 0.0 }
 0x4b3   : > { %v1571_v32 = vrot.slane %v1564_v19, %v5351_v42  ;;  %v1579_v33 = vrot.slane %v4601_v26, %v5351_v42  ;;  %v1580_v34 = vcombine.low %v1502_v24, %v1509_v25  ;;  %v4602_v35 = vcombine.high %v1502_v24, %v1509_v25  ;;  %1898 = vadd.xlane.f32.xlu0 %v1897_v31 }
 0x4b4   : > { %v1546_v38 = vcombine.low %v1521_v11, %v1529_v17  ;;  %v1554_v39 = vcombine.low %v1537_v27, %v1545_v29  ;;  %v2423_v61 = vshrl.u32 %v5479_v51, 16  ;;  %v2422_v62 = vshrl.u32 %v5481_v52, 16 }
 0x4b5   : > { %v1587_v40 = vrot.slane %v1580_v34, %v5351_v42  ;;  %v1595_v41 = vrot.slane %v4602_v35, %v5351_v42  ;;  %v1596_v43 = vcombine.low %v1571_v32, %v1579_v33  ;;  %v2415_v63 = vshrl.u32 %v5477_v50, 16 }
 0x4b6   : > { %v1553_v44 = vrot.slane %v1546_v38, %v5370_v1  ;;  %v1561_v45 = vrot.slane %v1554_v39, %v5370_v1  ;;  %v2420_v0 = vpack.i.b16 %v5479_v51, %v5481_v52  ;;  %v2414_v2 = vshrl.u32 %v5312_v10, 16 }
 0x4b7   : > { %1901 = vadd.xlane.f32.xlu0 %v1900_v37  ;;  %v1604_v46 = vcombine.low %v1587_v40, %v1595_v41  ;;  %v1603_v49 = vrot.slane %v1596_v43, %v5370_v1  ;;  %v2412_v6 = vpack.i.b16 %v5477_v50, %v5312_v10  ;;  %v2424_v7 = vpack.i.b16 %v2423_v61, %v2422_v62 }
 0x4b8   : > { %v1562_v47 = vcombine.low %v1553_v44, %v1561_v45  ;;  %v5545_v48 = vcombine.high %v1553_v44, %v1561_v45  ;;  %v2416_v11 = vpack.i.b16 %v2415_v63, %v2414_v2  ;;  %v2441_v17 = vcombine.high %v2420_v0, %v5346_v30 }
 0x4b9   : > { %v1611_v54 = vrot.slane %v1604_v46, %v5370_v1  ;;  %v2426_v21 = vcombine.high %v2412_v6, %v5346_v30  ;;  %v2507_v24 = vcombine.high %v2424_v7, %v5346_v30  ;;  %v2514_v27 = vrot.slane %v2424_v7, %v5351_v42 }
 0x4ba   : > { %v1618_v14 = vshrl.u32 %v1562_v47, 16  ;;  %v1626_v57 = vshrl.u32 %v5545_v48, 16  ;;  %v2492_v25 = vcombine.high %v2416_v11, %v5346_v30  ;;  %v2455_v26 = vrot.slane %v2441_v17, %v5351_v42 }
 0x4bb   : > { %v1612_v55 = vcombine.low %v1603_v49, %v1611_v54  ;;  %v5549_v56 = vcombine.high %v1603_v49, %v1611_v54  ;;  %v2440_v31 = vrot.slane %v2426_v21, %v5351_v42  ;;  %v2521_v32 = vrot.slane %v2507_v24, %v5351_v42 }
 0x4bc   : > { %v2499_v33 = vrot.slane %v2416_v11, %v5351_v42  ;;  %v2506_v34 = vrot.slane %v2492_v25, %v5351_v42  ;;  %v2448_v35 = vrot.slane %v2420_v0, %v5351_v42  ;;  %v2433_v41 = vrot.slane %v2412_v6, %v5351_v42 }
 0x4bd   : > { %v1616_v13 = vpack.i.b16 %v1612_v55, %v1562_v47  ;;  %v1619_v58 = vshrl.u32 %v1612_v55, 16  ;;  %v1624_v59 = vpack.i.b16 %v5549_v56, %v5545_v48  ;;  %v1627_v15 = vshrl.u32 %v5549_v56, 16 }
 0x4be   : > { %v2472_v37 = vcombine.low %v2440_v31, %v2455_v26  ;;  %v2473_v38 = vcombine.high %v2440_v31, %v2455_v26  ;;  %v2522_v39 = vcombine.low %v2499_v33, %v2514_v27  ;;  %v2523_v40 = vcombine.high %v2499_v33, %v2514_v27 }
 0x4bf   : > { %2672 = vrot.lane.b32.xlu1 %v5477_v50, %s5111_s15  ;;  %4760 = vmatpush3.bf16.msra.mxu1 %v1616_v13  ;;  %v1620_v60 = vpack.i.b16 %v1619_v58, %v1618_v14  ;;  %v5557_v12 = vpack.i.b16 %v1627_v15, %v1626_v57  ;;  %v2538_v43 = vcombine.low %v2506_v34, %v2521_v32 }
 0x4c0   : > { %4771 = vmatprep.subr.bf16.mxu1 %v5112_v16  ;;  %v2539_v44 = vcombine.high %v2506_v34, %v2521_v32  ;;  %v2456_v46 = vcombine.low %v2433_v41, %v2448_v35  ;;  %v2457_v47 = vcombine.high %v2433_v41, %v2448_v35  ;;  %v2480_v49 = vrot.slane %v2472_v37, %v5370_v1 }
 0x4c1   : > { %4766 = vmatpush3.bf16.msra.mxu0 %v1620_v60  ;;  %v2487_v54 = vrot.slane %v2473_v38, %v5370_v1  ;;  %v2530_v55 = vrot.slane %v2522_v39, %v5370_v1  ;;  %v2537_v14 = vrot.slane %v2523_v40, %v5370_v1  ;;  %v2546_v13 = vrot.slane %v2538_v43, %v5370_v1 }
 0x4c2   : > { %4777 = vmatprep.subr.bf16.mxu0 %v5112_v16  ;;  %v2553_v58 = vrot.slane %v2539_v44, %v5370_v1  ;;  %v5594_v62 = vrot.slane %v2456_v46, %v5370_v1  ;;  %v5597_v63 = vrot.slane %v2457_v47, %v5370_v1 }
 0x4c3   : > { %2674 = vrot.lane.b32.xlu1 %v5481_v52, %s5111_s15  ;;  %v2574_v0 = vcombine.low %v2480_v49, %v2487_v54  ;;  %v4616_v2 = vcombine.high %v2480_v49, %v2487_v54 }
 0x4c4   : > { %v2624_v11 = vcombine.low %v2546_v13, %v2553_v58  ;;  %v4615_v26 = vcombine.high %v5594_v62, %v5597_v63  ;;  %v4618_v31 = vcombine.high %v2546_v13, %v2553_v58 }
 0x4c6   : > { %v5619_v33 = vrot.slane %v2624_v11, %v5351_v42  ;;  %v5639_v58 = vrot.slane %v4618_v31, %v5351_v42 }
 0x4c7   : > { %2676 = vrot.lane.b32.xlu1 %v5479_v51, %s5111_s15 }
 0x4cd   : > { %2670 = vrot.lane.b32.xlu0 %v5312_v10, %s5111_s15 }
 0x526   : > { %v1881_v8 = vpop.xlane.xlu1 %1880 }
 0x527   : > { %4980 = vrcp.f32 %v1881_v8  ;;  %v4617_v8 = vcombine.high %v2530_v55, %v2537_v14 }
 0x529   : > { %v5616_v32 = vrot.slane %v4617_v8, %v5351_v42 }
 0x52a   : > { %v1893_v4 = vpop.xlane.xlu0 %1892 }
 0x52e   : > { %v1884_v18 = vpop.xlane.xlu0 %1883  ;;  %v1896_v19 = vpop.xlane.xlu1 %1895 }
 0x52f   : > { %4982 = vrcp.f32 %v1884_v18 }
 0x530   : > { %4984 = vrcp.f32 %v1896_v19  ;;  %v2558_v19 = vcombine.low %v5594_v62, %v5597_v63 }
 0x531   : > { %4986 = vrcp.f32 %v1893_v4  ;;  %v2608_v4 = vcombine.low %v2530_v55, %v2537_v14 }
 0x532   : > { %v1887_v29 = vpop.xlane.xlu0 %1886 }
 0x533   : > { %4988 = vrcp.f32 %v1887_v29  ;;  %v5606_v29 = vrot.slane %v2574_v0, %v5351_v42 }
 0x534   : > { %v4981_v57 = vpop.eup %4980 }
 0x535   : > { %v1911_v6 = vmul.f32 %v4981_v57, %v5483_v5  ;;  %v5609_v5 = vrot.slane %v4616_v2, %v5351_v42 }
 0x537   : > { %v1890_v45 = vpop.xlane.xlu1 %1889 }
 0x538   : > { %4990 = vrcp.f32 %v1890_v45 }
 0x53b   : > { %v2673_v15 = vpop.permute.xlu1 %2672 }
 0x53c   : > { %v1899_v60 = vpop.xlane.xlu0 %1898  ;;  %v4983_v61 = vpop.eup %4982  ;;  %v2683_v44 = vshrl.u32 %v2673_v15, 16 }
 0x53d   : > { %4992 = vrcp.f32 %v1899_v60  ;;  %v1912_v7 = vmul.f32 %v4983_v61, %v5491_v23  ;;  %v4985_v18 = vpop.eup %4984  ;;  %v5612_v23 = vrot.slane %v2608_v4, %v5351_v42 }
 0x53e   : > { %v4987_v25 = vpop.eup %4986  ;;  %v1916_v35 = vmul.f32 %v4985_v18, %v5493_v28 }
 0x53f   : > { %v2675_v17 = vpop.permute.xlu1 %2674  ;;  %v1919_v24 = vpack.c.bf16 %v1912_v7, %v1911_v6  ;;  %v1915_v41 = vmul.f32 %v4987_v25, %v5487_v20 }
 0x540   : > { %v1902_v21 = vpop.xlane.xlu0 %1901  ;;  %v4989_v27 = vpop.eup %4988  ;;  %v2690_v37 = vshrl.u32 %v2675_v17, 16 }
 0x541   : > { %4994 = vrcp.f32 %v1902_v21  ;;  %4762 = vmatmul.mubr.msk.bf16.vlgmr.msra.gmra.mxu1 %vm1830_vm5, %v1919_v24  ;;  %v1913_v48 = vmul.f32 %v4989_v27, %v5500_v36  ;;  %v1921_v55 = vpack.c.bf16 %v1916_v35, %v1915_v41 }
 0x542   : > { %4772 = vmatpush3.bf16.msra.mxu1 %v1624_v59  ;;  %4773 = vmatprep.mubr.msk.bf16.mxu1 %vm5113_vm2, %v5112_v16 }
 0x543   : > { %v2677_v34 = vpop.permute.xlu1 %2676  ;;  %4783 = vmatprep.subr.bf16.mxu1 %v5112_v16 }
 0x544   : > { %v2671_v38 = vpop.permute.xlu0 %2670  ;;  %v2688_v39 = vpack.i.b16 %v2677_v34, %v2675_v17  ;;  %v2691_v40 = vshrl.u32 %v2677_v34, 16 }
 0x545   : > { %v4991_v43 = vpop.eup %4990  ;;  %v2680_v45 = vpack.i.b16 %v2673_v15, %v2671_v38  ;;  %v2682_v46 = vshrl.u32 %v2671_v38, 16 }
 0x546   : > { %v2692_v56 = vpack.i.b16 %v2691_v40, %v2690_v37  ;;  %v2709_v59 = vcombine.high %v2688_v39, %v5346_v30  ;;  %v2716_v47 = vrot.slane %v2688_v39, %v5351_v42  ;;  %v1914_v28 = vmul.f32 %v4991_v43, %v5510_v53 }
 0x547   : > { %v2684_v49 = vpack.i.b16 %v2683_v44, %v2682_v46  ;;  %v2694_v54 = vcombine.high %v2680_v45, %v5346_v30  ;;  %v2701_v20 = vrot.slane %v2680_v45, %v5351_v42 }
 0x548   : > { %v2723_v14 = vrot.slane %v2709_v59, %v5351_v42  ;;  %v2775_v57 = vcombine.high %v2692_v56, %v5346_v30  ;;  %v2782_v13 = vrot.slane %v2692_v56, %v5351_v42  ;;  %v1920_v36 = vpack.c.bf16 %v1914_v28, %v1913_v48 }
 0x549   : > { %v2708_v15 = vrot.slane %v2694_v54, %v5351_v42  ;;  %v2760_v53 = vcombine.high %v2684_v49, %v5346_v30  ;;  %v2724_v60 = vcombine.low %v2701_v20, %v2716_v47  ;;  %v2767_v0 = vrot.slane %v2684_v49, %v5351_v42  ;;  %4774 = vmatmul.mubr.msk.bf16.vlgmr.msra.gmra.mxu1 %vm1830_vm5, %v1921_v55 }
 0x54a   : > { %v4993_v61 = vpop.eup %4992  ;;  %v2725_v2 = vcombine.high %v2701_v20, %v2716_v47  ;;  %v2789_v4 = vrot.slane %v2775_v57, %v5351_v42  ;;  %4768 = vmatmul.mubr.msk.bf16.vlgmr.msra.gmra.mxu0 %vm1830_vm5, %v1920_v36  ;;  %4785 = vmatprep.mubr.msk.bf16.mxu1 %vm5113_vm2, %v5112_v16  ;;  %v2565_v36 = vrot.slane %v2558_v19, %v5351_v42 }
 0x54b   : > { %v2774_v6 = vrot.slane %v2760_v53, %v5351_v42  ;;  %v2732_v7 = vrot.slane %v2724_v60, %v5370_v1  ;;  %v2740_v8 = vcombine.low %v2708_v15, %v2723_v14  ;;  %v2741_v11 = vcombine.high %v2708_v15, %v2723_v14  ;;  %4778 = vmatpush3.bf16.msra.mxu0 %v5557_v12 }
 0x54c   : > { %v2739_v17 = vrot.slane %v2725_v2, %v5370_v1  ;;  %v2790_v18 = vcombine.low %v2767_v0, %v2782_v13  ;;  %v2791_v21 = vcombine.high %v2767_v0, %v2782_v13  ;;  %4779 = vmatprep.mubr.msk.bf16.mxu0 %vm5113_vm2, %v5112_v16  ;;  %v1917_v24 = vmul.f32 %v4993_v61, %v5523_v3 }
 0x54d   : > { %v2748_v25 = vrot.slane %v2740_v8, %v5370_v1  ;;  %v2755_v27 = vrot.slane %v2741_v11, %v5370_v1  ;;  %v2806_v31 = vcombine.low %v2774_v6, %v2789_v4  ;;  %v2807_v34 = vcombine.high %v2774_v6, %v2789_v4  ;;  %4789 = vmatprep.subr.bf16.mxu0 %v5112_v16 }
 0x54e   : > { %v4995_v35 = vpop.eup %4994  ;;  %v2798_v12 = vrot.slane %v2790_v18, %v5370_v1  ;;  %v2805_v37 = vrot.slane %v2791_v21, %v5370_v1  ;;  %v2826_v38 = vcombine.low %v2732_v7, %v2739_v17  ;;  %v4619_v39 = vcombine.high %v2732_v7, %v2739_v17 }
 0x54f   : > { %v2814_v3 = vrot.slane %v2806_v31, %v5370_v1  ;;  %v2821_v40 = vrot.slane %v2807_v34, %v5370_v1  ;;  %v2842_v41 = vcombine.low %v2748_v25, %v2755_v27  ;;  %v4620_v43 = vcombine.high %v2748_v25, %v2755_v27 }
 0x550   : > { %v2833_v44 = vrot.slane %v2826_v38, %v5351_v42  ;;  %v2841_v45 = vrot.slane %v4619_v39, %v5351_v42  ;;  %v2876_v46 = vcombine.low %v2798_v12, %v2805_v37  ;;  %v4621_v48 = vcombine.high %v2798_v12, %v2805_v37 }
 0x551   : > { %v2892_v56 = vcombine.low %v2814_v3, %v2821_v40  ;;  %v4622_v59 = vcombine.high %v2814_v3, %v2821_v40  ;;  %v1918_v47 = vmul.f32 %v4995_v35, %v5529_v22  ;;  %v2849_v28 = vrot.slane %v2842_v41, %v5351_v42 }
 0x552   : > { %v2857_v49 = vrot.slane %v4620_v43, %v5351_v42  ;;  %v2858_v54 = vcombine.low %v2833_v44, %v2841_v45  ;;  %v2883_v20 = vrot.slane %v2876_v46, %v5351_v42  ;;  %v2891_v55 = vrot.slane %v4621_v48, %v5351_v42 }
 0x553   : > { %v1922_v14 = vpack.c.bf16 %v1918_v47, %v1917_v24  ;;  %v2899_v57 = vrot.slane %v2892_v56, %v5351_v42  ;;  %v2907_v13 = vrot.slane %v4622_v59, %v5351_v42  ;;  %v2573_v22 = vrot.slane %v4615_v26, %v5351_v42 }
 0x554   : > { %v2866_v15 = vcombine.low %v2849_v28, %v2857_v49  ;;  %v2908_v53 = vcombine.low %v2883_v20, %v2891_v55  ;;  %v2648_v61 = vcombine.low %v5619_v33, %v5639_v58  ;;  %v2865_v0 = vrot.slane %v2858_v54, %v5370_v1 }
 0x555   : > { %4780 = vmatmul.mubr.msk.bf16.vlgmr.msra.gmra.mxu0 %vm1830_vm5, %v1922_v14  ;;  %v2916_v60 = vcombine.low %v2899_v57, %v2907_v13  ;;  %v2598_v19 = vcombine.low %v5606_v29, %v5609_v5  ;;  %v2640_v4 = vcombine.low %v5612_v23, %v5616_v32  ;;  %v2590_v26 = vcombine.low %v2565_v36, %v2573_v22 }
 0x556   : > { %v2873_v2 = vrot.slane %v2866_v15, %v5370_v1  ;;  %4791 = vmatprep.mubr.msk.bf16.mxu0 %vm5113_vm2, %v5112_v16  ;;  %v2915_v62 = vrot.slane %v2908_v53, %v5370_v1  ;;  %v2655_v58 = vrot.slane %v2648_v61, %v5370_v1 }
 0x557   : > { %v2923_v63 = vrot.slane %v2916_v60, %v5370_v1  ;;  %v2605_v7 = vrot.slane %v2598_v19, %v5370_v1  ;;  %v2647_v8 = vrot.slane %v2640_v4, %v5370_v1  ;;  %v2597_v32 = vrot.slane %v2590_v26, %v5370_v1 }
 0x558   : > { %v2874_v6 = vcombine.low %v2865_v0, %v2873_v2  ;;  %v2875_v24 = vcombine.high %v2865_v0, %v2873_v2 }
 0x559   : > { %v2924_v33 = vcombine.low %v2915_v62, %v2923_v63  ;;  %v2925_v23 = vcombine.high %v2915_v62, %v2923_v63  ;;  %v2656_v21 = vcombine.low %v2647_v8, %v2655_v58  ;;  %v2606_v27 = vcombine.low %v2597_v32, %v2605_v7 }
 0x55a   : > { %v2929_v5 = vshrl.u32 %v2874_v6, 16  ;;  %v2935_v12 = vshrl.u32 %v2875_v24, 16  ;;  %v2657_v41 = vcombine.high %v2647_v8, %v2655_v58  ;;  %v2607_v44 = vcombine.high %v2597_v32, %v2605_v7 }
 0x55b   : > { %v2928_v29 = vpack.i.b16 %v2924_v33, %v2874_v6  ;;  %v2930_v11 = vshrl.u32 %v2924_v33, 16  ;;  %v2936_v31 = vshrl.u32 %v2925_v23, 16  ;;  %v2934_v34 = vpack.i.b16 %v2925_v23, %v2875_v24 }
 0x55c   : > { %v2662_v35 = vshrl.u32 %v2656_v21, 16  ;;  %v2660_v37 = vpack.i.b16 %v2656_v21, %v2606_v27  ;;  %v2661_v38 = vshrl.u32 %v2606_v27, 16  ;;  %v2668_v45 = vshrl.u32 %v2657_v41, 16 }
 0x55d   : > { %v3214_v17 = vsel %vm1630_vm3, %v2928_v29, 0  ;;  %v2931_v18 = vpack.i.b16 %v2930_v11, %v2929_v5  ;;  %v2937_v39 = vpack.i.b16 %v2936_v31, %v2935_v12  ;;  %v3308_v3 = vsel %vm1630_vm3, %v2934_v34, 0 }
 0x55e   : > { %4784 = vmatpush3.bf16.xpose.msra.mxu1 %v3214_v17  ;;  %v2663_v40 = vpack.i.b16 %v2662_v35, %v2661_v38  ;;  %v2666_v46 = vpack.i.b16 %v2657_v41, %v2607_v44  ;;  %v2667_v48 = vshrl.u32 %v2607_v44, 16 }
 0x55f   : > { %v3261_v25 = vsel %vm1630_vm3, %v2931_v18, 0  ;;  %4795 = vmatprep.subr.bf16.mxu1 %v5112_v16  ;;  %v3355_v43 = vsel %vm1630_vm3, %v2937_v39, 0 }
 0x560   : > { %4790 = vmatpush3.bf16.xpose.msra.mxu0 %v3261_v25  ;;  %v2669_v56 = vpack.i.b16 %v2668_v45, %v2667_v48 }
 0x561   : > { %4801 = vmatprep.subr.bf16.mxu0 %v5112_v16 }
 0x565   : > { %4786 = vmatmul.mubr.msk.bf16.vlgmr.msra.gmra.mxu1 %vm1630_vm3, %v2660_v37 }
 0x566   : > { %4796 = vmatpush3.bf16.xpose.msra.mxu1 %v3308_v3  ;;  %4797 = vmatprep.mubr.msk.bf16.mxu1 %vm5113_vm2, %v5112_v16 }
 0x567   : > { %4792 = vmatmul.mubr.msk.bf16.vlgmr.msra.gmra.mxu0 %vm1630_vm3, %v2663_v40  ;;  %4807 = vmatprep.subr.bf16.mxu1 %v5112_v16 }
 0x568   : > { %4802 = vmatpush3.bf16.xpose.msra.mxu0 %v3355_v43  ;;  %4803 = vmatprep.mubr.msk.bf16.mxu0 %vm5113_vm2, %v5112_v16 }
 0x569   : > { %4813 = vmatprep.subr.bf16.mxu0 %v5112_v16 }
 0x56d   : > { %4798 = vmatmul.mubr.msk.bf16.vlgmr.msra.gmra.mxu1 %vm1630_vm3, %v2666_v46 }
 0x56e   : > { %4809 = vmatprep.mubr.msk.bf16.mxu1 %vm5113_vm2, %v5112_v16 }
 0x56f   : > { %4804 = vmatmul.mubr.msk.bf16.vlgmr.msra.gmra.mxu0 %vm1630_vm3, %v2669_v56 }
 0x570   : > { %4815 = vmatprep.mubr.msk.bf16.mxu0 %vm5113_vm2, %v5112_v16 }
 0x601   : > { %v1960_v59 = vpop.f32.mrf.mxu1 }
 0x603   : > { %v4763_v47 = vpop.f32.mrf.mxu1 }
 0x605   : > { %v1963_v28 = vpop.f32.mrf.mxu1 }
 0x607   : > { %v4764_v49 = vpop.f32.mrf.mxu1 }
 0x609   : > { %v2048_v20 = vpop.f32.mrf.mxu1 }
 0x60a   : > { %v2004_v54 = vpop.f32.mrf.mxu0  ;;  %v2099_v55 = vcombine.low %v1960_v59, %v2048_v20  ;;  %v2100_v14 = vcombine.high %v1960_v59, %v2048_v20 }
 0x60b   : > { %v4775_v13 = vpop.f32.mrf.mxu1 }
 0x60c   : > { %v4769_v57 = vpop.f32.mrf.mxu0  ;;  %v2107_v62 = vrot.slane %v2099_v55, %v5351_v42  ;;  %v2114_v63 = vrot.slane %v2100_v14, %v5351_v42 }
 0x60d   : > { %v2051_v22 = vpop.f32.mrf.mxu1 }
 0x60e   : > { %v2007_v36 = vpop.f32.mrf.mxu0  ;;  %v2167_v15 = vcombine.low %v1963_v28, %v2051_v22  ;;  %v2168_v53 = vcombine.high %v1963_v28, %v2051_v22 }
 0x60f   : > { %v4776_v61 = vpop.f32.mrf.mxu1 }
 0x610   : > { %v4770_v60 = vpop.f32.mrf.mxu0  ;;  %v2175_v24 = vrot.slane %v2167_v15, %v5351_v42  ;;  %v2182_v25 = vrot.slane %v2168_v53, %v5351_v42 }
 0x615   : > { %v2092_v0 = vpop.f32.mrf.mxu0 }
 0x616   : > { %v2115_v2 = vcombine.low %v2004_v54, %v2092_v0  ;;  %v2116_v19 = vcombine.high %v2004_v54, %v2092_v0 }
 0x617   : > { %v4781_v4 = vpop.f32.mrf.mxu0 }
 0x618   : > { %v2123_v26 = vrot.slane %v2115_v2, %v5351_v42  ;;  %v2130_v6 = vrot.slane %v2116_v19, %v5351_v42 }
 0x619   : > { %v2095_v33 = vpop.f32.mrf.mxu0 }
 0x61a   : > { %v2131_v58 = vcombine.low %v2107_v62, %v2123_v26  ;;  %v2132_v7 = vcombine.high %v2107_v62, %v2123_v26  ;;  %v2147_v8 = vcombine.low %v2114_v63, %v2130_v6  ;;  %v2148_v29 = vcombine.high %v2114_v63, %v2130_v6 }
 0x61b   : > { %v2183_v5 = vcombine.low %v2007_v36, %v2095_v33  ;;  %v2184_v11 = vcombine.high %v2007_v36, %v2095_v33  ;;  %v4782_v23 = vpop.f32.mrf.mxu0 }
 0x61c   : > { %v2139_v32 = vrot.slane %v2131_v58, %v5370_v1  ;;  %v2146_v17 = vrot.slane %v2132_v7, %v5370_v1  ;;  %v2155_v18 = vrot.slane %v2147_v8, %v5370_v1  ;;  %v2162_v21 = vrot.slane %v2148_v29, %v5370_v1 }
 0x61d   : > { %v2191_v27 = vrot.slane %v2183_v5, %v5351_v42  ;;  %v2198_v31 = vrot.slane %v2184_v11, %v5351_v42 }
 0x61e   : > { %v2235_v34 = vcombine.low %v2139_v32, %v2146_v17  ;;  %v4611_v35 = vcombine.high %v2139_v32, %v2146_v17  ;;  %v2251_v12 = vcombine.low %v2155_v18, %v2162_v21  ;;  %v4612_v37 = vcombine.high %v2155_v18, %v2162_v21 }
 0x61f   : > { %v2199_v38 = vcombine.low %v2175_v24, %v2191_v27  ;;  %v2200_v39 = vcombine.high %v2175_v24, %v2191_v27  ;;  %v2215_v3 = vcombine.low %v2182_v25, %v2198_v31  ;;  %v2216_v40 = vcombine.high %v2182_v25, %v2198_v31 }
 0x620   : > { %v2242_v41 = vrot.slane %v2235_v34, %v5351_v42  ;;  %v2250_v43 = vrot.slane %v4611_v35, %v5351_v42  ;;  %v2258_v44 = vrot.slane %v2251_v12, %v5351_v42  ;;  %v2266_v45 = vrot.slane %v4612_v37, %v5351_v42 }
 0x621   : > { %v2207_v46 = vrot.slane %v2199_v38, %v5370_v1  ;;  %v2214_v48 = vrot.slane %v2200_v39, %v5370_v1  ;;  %v2223_v56 = vrot.slane %v2215_v3, %v5370_v1  ;;  %v2230_v59 = vrot.slane %v2216_v40, %v5370_v1 }
 0x622   : > { %v2268_v47 = vcombine.high %v2242_v41, %v2250_v43  ;;  %v2284_v28 = vcombine.high %v2258_v44, %v2266_v45  ;;  %v2267_v49 = vcombine.low %v2242_v41, %v2250_v43  ;;  %v2283_v54 = vcombine.low %v2258_v44, %v2266_v45 }
 0x623   : > { %v2303_v20 = vcombine.low %v2207_v46, %v2214_v48  ;;  %v4613_v55 = vcombine.high %v2207_v46, %v2214_v48  ;;  %v2319_v14 = vcombine.low %v2223_v56, %v2230_v59  ;;  %v4614_v57 = vcombine.high %v2223_v56, %v2230_v59 }
 0x624   : > { %v2282_v13 = vrot.slane %v2268_v47, %v5370_v1  ;;  %v2298_v36 = vrot.slane %v2284_v28, %v5370_v1  ;;  %v5740_v22 = vrot.slane %v2267_v49, %v5370_v1  ;;  %v5743_v15 = vrot.slane %v2283_v54, %v5370_v1 }
 0x625   : > { %v2310_v53 = vrot.slane %v2303_v20, %v5351_v42  ;;  %v2318_v60 = vrot.slane %v4613_v55, %v5351_v42  ;;  %v2326_v61 = vrot.slane %v2319_v14, %v5351_v42  ;;  %v2334_v0 = vrot.slane %v4614_v57, %v5351_v42  ;;  %v3250_v2 = vpop.f32.mrf.mxu1 }
 0x626   : > { %v5751_v19 = vsel %vm1821_vm4, %v3250_v2, -1e+30  ;;  %v2301_v4 = vcombine.low %v2282_v13, %v2298_v36  ;;  %v2302_v62 = vcombine.high %v2282_v13, %v2298_v36  ;;  %v2299_v63 = vcombine.low %v5740_v22, %v5743_v15 }
 0x627   : > { %v4787_v26 = vpop.f32.mrf.mxu1  ;;  %v3297_v6 = vpop.f32.mrf.mxu0  ;;  %v3406_v33 = vsel %vm1830_vm5, %v5751_v19, -inf  ;;  %v2336_v58 = vcombine.high %v2310_v53, %v2318_v60  ;;  %v2352_v7 = vcombine.high %v2326_v61, %v2334_v0  ;;  %v2300_v8 = vcombine.high %v5740_v22, %v5743_v15 }
 0x628   : > { %v3400_v29 = vsel %vm1821_vm4, %v3297_v6, -1e+30  ;;  %3407 = vmax.xlane.f32.xlu0 %v3406_v33  ;;  %v2335_v5 = vcombine.low %v2310_v53, %v2318_v60  ;;  %v2351_v11 = vcombine.low %v2326_v61, %v2334_v0 }
 0x629   : > { %v3253_v23 = vpop.f32.mrf.mxu1  ;;  %v4793_v32 = vpop.f32.mrf.mxu0  ;;  %v2350_v17 = vrot.slane %v2336_v58, %v5370_v1  ;;  %v2366_v18 = vrot.slane %v2352_v7, %v5370_v1  ;;  %v3412_v35 = vsel %vm1830_vm5, %v3400_v29, -inf }
 0x62a   : > { %v3399_v21 = vsel %vm1821_vm4, %v3253_v23, -1e+30  ;;  %v5766_v24 = vrot.slane %v2335_v5, %v5370_v1  ;;  %v5769_v25 = vrot.slane %v2351_v11, %v5370_v1 }
 0x62b   : > { %v4788_v27 = vpop.f32.mrf.mxu1  ;;  %v3300_v31 = vpop.f32.mrf.mxu0  ;;  %v3409_v34 = vsel %vm1830_vm5, %v3399_v21, -inf  ;;  %v2369_v12 = vcombine.low %v2350_v17, %v2366_v18  ;;  %v2370_v37 = vcombine.high %v2350_v17, %v2366_v18 }
 0x62c   : > { %v3401_v38 = vsel %vm1821_vm4, %v3300_v31, -1e+30  ;;  %3410 = vmax.xlane.f32.xlu1 %v3409_v34  ;;  %3413 = vmax.xlane.f32.xlu0 %v3412_v35  ;;  %v2368_v39 = vcombine.high %v5766_v24, %v5769_v25  ;;  %v2367_v3 = vcombine.low %v5766_v24, %v5769_v25 }
 0x62d   : > { %v4794_v40 = vpop.f32.mrf.mxu0  ;;  %v3344_v41 = vpop.f32.mrf.mxu1  ;;  %v5779_v43 = vpack.i.bf16 %v2369_v12, %v2301_v4  ;;  %v5781_v44 = vpack.i.bf16 %v2370_v37, %v2302_v62  ;;  %v3415_v56 = vsel %vm1830_vm5, %v3401_v38, -inf }
 0x62e   : > { %v5783_v45 = vpack.i.bf16 %v2368_v39, %v2300_v8  ;;  %v3402_v59 = vsel %vm1821_vm4, %v3344_v41, -1e+30 }
 0x62f   : > { %v4799_v46 = vpop.f32.mrf.mxu1  ;;  %v3391_v48 = vpop.f32.mrf.mxu0  ;;  %v3418_v14 = vsel %vm1830_vm5, %v3402_v59, -inf }
 0x630   : > { %3416 = vmax.xlane.f32.xlu0 %v3415_v56  ;;  %v3404_v57 = vsel %vm1821_vm4, %v3391_v48, -1e+30 }
 0x631   : > { %v3347_v47 = vpop.f32.mrf.mxu1  ;;  %v4805_v28 = vpop.f32.mrf.mxu0  ;;  %v3424_v36 = vsel %vm1830_vm5, %v3404_v57, -inf }
 0x632   : > { %v3403_v49 = vsel %vm1821_vm4, %v3347_v47, -1e+30 }
 0x633   : > { %v4800_v54 = vpop.f32.mrf.mxu1  ;;  %v3394_v20 = vpop.f32.mrf.mxu0  ;;  %v3421_v55 = vsel %vm1830_vm5, %v3403_v49, -inf }
 0x634   : > { %3422 = vmax.xlane.f32.xlu1 %v3421_v55  ;;  %3419 = vmax.xlane.f32.xlu0 %v3418_v14  ;;  %v3405_v53 = vsel %vm1821_vm4, %v3394_v20, -1e+30 }
 0x635   : > { %v4806_v13 = vpop.f32.mrf.mxu0  ;;  %v3427_v60 = vsel %vm1830_vm5, %v3405_v53, -inf }
 0x638   : > { %3425 = vmax.xlane.f32.xlu0 %v3424_v36 }
 0x645   : > { %2940 = vrot.lane.b32.xlu1 %v5477_v50, %s5117_s16 }
 0x64e   : > { %2938 = vrot.lane.b32.xlu0 %v5312_v10, %s5117_s16 }
 0x669   : > { %3428 = vmax.xlane.f32.xlu1 %v3427_v60 }
 0x67a   : > { %2942 = vrot.lane.b32.xlu1 %v5481_v52, %s5117_s16 }
 0x6b1   : > { %v3408_v61 = vpop.xlane.xlu0 %3407 }
 0x6b2   : > { %v3430_v0 = vsub.f32 %v5751_v19, %v3408_v61 }
 0x6b4   : > { %v3438_v2 = vmul.f32 1.442695, %v3430_v0 }
 0x6b5   : > { %v3411_v4 = vpop.xlane.xlu1 %3410  ;;  %v3414_v62 = vpop.xlane.xlu0 %3413 }
 0x6b6   : > { %4996 = vpow2.f32 %v3438_v2  ;;  %v3431_v50 = vsub.f32 %v3399_v21, %v3411_v4  ;;  %v3432_v26 = vsub.f32 %v3400_v29, %v3414_v62 }
 0x6b8   : > { %v3440_v6 = vmul.f32 1.442695, %v3431_v50  ;;  %v3442_v10 = vmul.f32 1.442695, %v3432_v26 }
 0x6b9   : > { %v3417_v33 = vpop.xlane.xlu0 %3416 }
 0x6ba   : > { %4998 = vpow2.f32 %v3440_v6  ;;  %v3433_v9 = vsub.f32 %v3401_v38, %v3417_v33 }
 0x6bb   : > { %5000 = vpow2.f32 %v3442_v10 }
 0x6bc   : > { %v3444_v58 = vmul.f32 1.442695, %v3433_v9 }
 0x6bd   : > { %v3420_v7 = vpop.xlane.xlu0 %3419  ;;  %v3423_v38 = vpop.xlane.xlu1 %3422 }
 0x6be   : > { %5002 = vpow2.f32 %v3444_v58  ;;  %v3434_v8 = vsub.f32 %v3402_v59, %v3420_v7  ;;  %v3435_v39 = vsub.f32 %v3403_v49, %v3423_v38 }
 0x6c0   : > { %v3446_v52 = vmul.f32 1.442695, %v3434_v8  ;;  %v3448_v40 = vmul.f32 1.442695, %v3435_v39 }
 0x6c1   : > { %v3426_v5 = vpop.xlane.xlu0 %3425  ;;  %v2941_v41 = vpop.permute.xlu1 %2940 }
 0x6c2   : > { %v3436_v11 = vsub.f32 %v3404_v57, %v3426_v5  ;;  %5004 = vpow2.f32 %v3446_v52  ;;  %v2951_v14 = vshrl.u32 %v2941_v41, 16 }
 0x6c3   : > { %v5805_v19 = vpop.eup %4996 }
 0x6c4   : > { %v3450_v23 = vmul.f32 1.442695, %v3436_v11  ;;  %v3454_v29 = vsel %vm1830_vm5, %v5805_v19, 0.0 }
 0x6c5   : > { %3455 = vadd.xlane.f32.xlu0 %v3454_v29  ;;  %v2939_v54 = vpop.permute.xlu0 %2938 }
 0x6c6   : > { %5006 = vpow2.f32 %v3450_v23  ;;  %v2950_v55 = vshrl.u32 %v2939_v54, 16  ;;  %v2948_v57 = vpack.i.b16 %v2941_v41, %v2939_v54 }
 0x6c7   : > { %v5809_v32 = vpop.eup %4998  ;;  %5008 = vpow2.f32 %v3448_v40 }
 0x6c8   : > { %v5811_v17 = vpop.eup %5000  ;;  %v3457_v18 = vsel %vm1830_vm5, %v5809_v32, 0.0  ;;  %v2962_v60 = vcombine.high %v2948_v57, %v5346_v30 }
 0x6c9   : > { %v3460_v21 = vsel %vm1830_vm5, %v5811_v17, 0.0  ;;  %3458 = vadd.xlane.f32.xlu1 %v3457_v18 }
 0x6ca   : > { %3461 = vadd.xlane.f32.xlu0 %v3460_v21  ;;  %v2976_v6 = vrot.slane %v2962_v60, %v5351_v42 }
 0x6cb   : > { %v5817_v27 = vpop.eup %5002 }
 0x6cc   : > { %v3463_v31 = vsel %vm1830_vm5, %v5817_v27, 0.0 }
 0x6cd   : > { %3464 = vadd.xlane.f32.xlu1 %v3463_v31 }
 0x6cf   : > { %v5821_v34 = vpop.eup %5004 }
 0x6d0   : > { %v3466_v35 = vsel %vm1830_vm5, %v5821_v34, 0.0 }
 0x6d1   : > { %3467 = vadd.xlane.f32.xlu0 %v3466_v35 }
 0x6d3   : > { %v5825_v12 = vpop.eup %5006 }
 0x6d4   : > { %v3472_v37 = vsel %vm1830_vm5, %v5825_v12, 0.0  ;;  %v5831_v59 = vpop.eup %5008 }
 0x6d5   : > { %3473 = vadd.xlane.f32.xlu0 %v3472_v37  ;;  %v3469_v47 = vsel %vm1830_vm5, %v5831_v59, 0.0 }
 0x6de   : > { %2944 = vrot.lane.b32.xlu1 %v5479_v51, %s5117_s16 }
 0x6f2   : > { %v3429_v46 = vpop.xlane.xlu1 %3428 }
 0x6f3   : > { %v3437_v48 = vsub.f32 %v3405_v53, %v3429_v46  ;;  %v2952_v53 = vpack.i.b16 %v2951_v14, %v2950_v55 }
 0x6f5   : > { %v3452_v56 = vmul.f32 1.442695, %v3437_v48  ;;  %v3028_v4 = vcombine.high %v2952_v53, %v5346_v30  ;;  %v3035_v7 = vrot.slane %v2952_v53, %v5351_v42 }
 0x6f6   : > { %v2943_v49 = vpop.permute.xlu1 %2942 }
 0x6f7   : > { %5010 = vpow2.f32 %v3452_v56  ;;  %v2958_v61 = vshrl.u32 %v2943_v49, 16  ;;  %v3042_v8 = vrot.slane %v3028_v4, %v5351_v42 }
 0x702   : > { %3470 = vadd.xlane.f32.xlu1 %v3469_v47 }
 0x704   : > { %v5835_v28 = vpop.eup %5010 }
 0x705   : > { %v3475_v51 = vsel %vm1830_vm5, %v5835_v28, 0.0 }
 0x706   : > { %3476 = vadd.xlane.f32.xlu0 %v3475_v51 }
 0x713   : > { %4918 = vrot.lane.b32.xlu1 %v5779_v43, %s5118_s19 }
 0x717   : > { %4923 = vrot.lane.b32.xlu1 %v5781_v44, %s5119_s18  ;;  %v2969_v44 = vrot.slane %v2948_v57, %v5351_v42 }
 0x71c   : > { %4913 = vrot.lane.b32.xlu0 %v5783_v45, %s5120_s22 }
 0x74e   : > { %v3456_v36 = vpop.xlane.xlu0 %3455 }
 0x74f   : > { %5012 = vrcp.f32 %v3456_v36 }
 0x752   : > { %v3459_v20 = vpop.xlane.xlu1 %3458 }
 0x753   : > { %v3462_v45 = vpop.xlane.xlu0 %3461  ;;  %5014 = vrcp.f32 %v3459_v20 }
 0x754   : > { %5016 = vrcp.f32 %v3462_v45 }
 0x756   : > { %v3465_v13 = vpop.xlane.xlu1 %3464 }
 0x757   : > { %5018 = vrcp.f32 %v3465_v13 }
 0x75a   : > { %v2945_v43 = vpop.permute.xlu1 %2944 }
 0x75b   : > { %v2956_v0 = vpack.i.b16 %v2945_v43, %v2943_v49  ;;  %v2959_v2 = vshrl.u32 %v2945_v43, 16 }
 0x75d   : > { %v2960_v62 = vpack.i.b16 %v2959_v2, %v2958_v61  ;;  %v2977_v50 = vcombine.high %v2956_v0, %v5346_v30  ;;  %v2984_v26 = vrot.slane %v2956_v0, %v5351_v42  ;;  %v5013_v0 = vpop.eup %5012 }
 0x75f   : > { %v2991_v10 = vrot.slane %v2977_v50, %v5351_v42  ;;  %v2992_v33 = vcombine.low %v2969_v44, %v2984_v26  ;;  %v2993_v9 = vcombine.high %v2969_v44, %v2984_v26  ;;  %v3043_v58 = vcombine.high %v2960_v62, %v5346_v30 }
 0x760   : > { %v3050_v52 = vrot.slane %v2960_v62, %v5351_v42  ;;  %v5015_v45 = vpop.eup %5014 }
 0x761   : > { %v3000_v5 = vrot.slane %v2992_v33, %v5370_v1  ;;  %v3007_v11 = vrot.slane %v2993_v9, %v5370_v1  ;;  %v3008_v23 = vcombine.low %v2976_v6, %v2991_v10  ;;  %v3009_v29 = vcombine.high %v2976_v6, %v2991_v10  ;;  %v5017_v6 = vpop.eup %5016 }
 0x762   : > { %v3057_v18 = vrot.slane %v3043_v58, %v5351_v42  ;;  %v3058_v21 = vcombine.low %v3035_v7, %v3050_v52  ;;  %v3059_v31 = vcombine.high %v3035_v7, %v3050_v52  ;;  %v3487_v52 = vmul.f32 %v5015_v45, %v5809_v32 }
 0x763   : > { %v3016_v30 = vrot.slane %v3008_v23, %v5370_v1  ;;  %v3023_v35 = vrot.slane %v3009_v29, %v5370_v1  ;;  %v3094_v37 = vcombine.low %v3000_v5, %v3007_v11  ;;  %v4623_v38 = vcombine.high %v3000_v5, %v3007_v11 }
 0x764   : > { %v3066_v39 = vrot.slane %v3058_v21, %v5370_v1  ;;  %v3073_v40 = vrot.slane %v3059_v31, %v5370_v1  ;;  %v3074_v41 = vcombine.low %v3042_v8, %v3057_v18  ;;  %v3075_v46 = vcombine.high %v3042_v8, %v3057_v18  ;;  %v5019_v58 = vpop.eup %5018 }
 0x765   : > { %v3101_v48 = vrot.slane %v3094_v37, %v5351_v42  ;;  %v3109_v56 = vrot.slane %v4623_v38, %v5351_v42  ;;  %v3110_v47 = vcombine.low %v3016_v30, %v3023_v35  ;;  %v4624_v51 = vcombine.high %v3016_v30, %v3023_v35 }
 0x766   : > { %v3082_v49 = vrot.slane %v3074_v41, %v5370_v1  ;;  %v3089_v54 = vrot.slane %v3075_v46, %v5370_v1  ;;  %v3144_v20 = vcombine.low %v3066_v39, %v3073_v40  ;;  %v4625_v55 = vcombine.high %v3066_v39, %v3073_v40 }
 0x767   : > { %v3117_v14 = vrot.slane %v3110_v47, %v5351_v42  ;;  %v3125_v57 = vrot.slane %v4624_v51, %v5351_v42  ;;  %v3126_v13 = vcombine.low %v3101_v48, %v3109_v56  ;;  %v3486_v18 = vmul.f32 %v5013_v0, %v5805_v19 }
 0x768   : > { %v3151_v36 = vrot.slane %v3144_v20, %v5351_v42  ;;  %v3159_v53 = vrot.slane %v4625_v55, %v5351_v42  ;;  %v3160_v60 = vcombine.low %v3082_v49, %v3089_v54  ;;  %v4626_v43 = vcombine.high %v3082_v49, %v3089_v54 }
 0x769   : > { %v3134_v61 = vcombine.low %v3117_v14, %v3125_v57  ;;  %v3133_v50 = vrot.slane %v3126_v13, %v5370_v1  ;;  %v3489_v21 = vmul.f32 %v5019_v58, %v5817_v27  ;;  %v3494_v35 = vpack.c.bf16 %v3487_v52, %v3486_v18 }
 0x76a   : > { %v3167_v2 = vrot.slane %v3160_v60, %v5351_v42  ;;  %v3175_v44 = vrot.slane %v4626_v43, %v5351_v42  ;;  %v3176_v4 = vcombine.low %v3151_v36, %v3159_v53  ;;  %v3488_v37 = vmul.f32 %v5017_v6, %v5811_v17  ;;  %v3468_v17 = vpop.xlane.xlu0 %3467 }
 0x76b   : > { %v3141_v62 = vrot.slane %v3134_v61, %v5370_v1  ;;  %5020 = vrcp.f32 %v3468_v17 }
 0x76c   : > { %v3184_v26 = vcombine.low %v3167_v2, %v3175_v44  ;;  %v3183_v33 = vrot.slane %v3176_v4, %v5370_v1  ;;  %v3495_v32 = vpack.c.bf16 %v3489_v21, %v3488_v37 }
 0x76d   : > { %v3142_v10 = vcombine.low %v3133_v50, %v3141_v62  ;;  %v3143_v29 = vcombine.high %v3133_v50, %v3141_v62 }
 0x76e   : > { %v3191_v9 = vrot.slane %v3184_v26, %v5370_v1  ;;  %v3474_v27 = vpop.xlane.xlu0 %3473 }
 0x76f   : > { %v3198_v11 = vshrl.u32 %v3142_v10, 16  ;;  %v3206_v39 = vshrl.u32 %v3143_v29, 16 }
 0x770   : > { %v3192_v7 = vcombine.low %v3183_v33, %v3191_v9  ;;  %v3193_v8 = vcombine.high %v3183_v33, %v3191_v9 }
 0x772   : > { %v3196_v5 = vpack.i.b16 %v3192_v7, %v3142_v10  ;;  %v3199_v23 = vshrl.u32 %v3192_v7, 16  ;;  %v3207_v30 = vshrl.u32 %v3193_v8, 16  ;;  %v3204_v38 = vpack.i.b16 %v3193_v8, %v3143_v29 }
 0x774   : > { %4808 = vmatpush3.bf16.msra.mxu1 %v3196_v5  ;;  %v3200_v31 = vpack.i.b16 %v3199_v23, %v3198_v11  ;;  %v3208_v19 = vpack.i.b16 %v3207_v30, %v3206_v39 }
 0x775   : > { %4819 = vmatprep.subr.bf16.mxu1 %v5112_v16 }
 0x776   : > { %4814 = vmatpush3.bf16.msra.mxu0 %v3200_v31 }
 0x777   : > { %4810 = vmatmul.mubr.msk.bf16.vlgmr.msra.gmra.mxu1 %vm1830_vm5, %v3494_v35  ;;  %4825 = vmatprep.subr.bf16.mxu0 %v5112_v16 }
 0x778   : > { %4820 = vmatpush3.bf16.msra.mxu1 %v3204_v38  ;;  %4821 = vmatprep.mubr.msk.bf16.mxu1 %vm5113_vm2, %v5112_v16  ;;  %v5021_v57 = vpop.eup %5020 }
 0x779   : > { %4816 = vmatmul.mubr.msk.bf16.vlgmr.msra.gmra.mxu0 %vm1830_vm5, %v3495_v32  ;;  %v3490_v25 = vmul.f32 %v5021_v57, %v5821_v34 }
 0x77a   : > { %4826 = vmatpush3.bf16.msra.mxu0 %v3208_v19  ;;  %4827 = vmatprep.mubr.msk.bf16.mxu0 %vm5113_vm2, %v5112_v16 }
 0x78b   : > { %v3471_v40 = vpop.xlane.xlu1 %3470 }
 0x78c   : > { %5022 = vrcp.f32 %v3471_v40 }
 0x78d   : > { %5024 = vrcp.f32 %v3474_v27 }
 0x78f   : > { %v3477_v41 = vpop.xlane.xlu0 %3476  ;;  %v4919_v46 = vpop.permute.xlu1 %4918 }
 0x790   : > { %5026 = vrcp.f32 %v3477_v41  ;;  %v4921_v49 = vunpack.i.h.bf16 %v4919_v46  ;;  %v4920_v54 = vunpack.i.l.bf16 %v4919_v46 }
 0x793   : > { %v4914_v48 = vpop.permute.xlu0 %4913  ;;  %v4924_v56 = vpop.permute.xlu1 %4923 }
 0x794   : > { %v4916_v47 = vunpack.i.h.bf16 %v4914_v48  ;;  %v4915_v51 = vunpack.i.l.bf16 %v4914_v48  ;;  %v4926_v55 = vunpack.i.h.bf16 %v4924_v56  ;;  %v4925_v14 = vunpack.i.l.bf16 %v4924_v56 }
 0x796   : > { %v2396_v16 = vsel %vm1630_vm3, %v2367_v3, %v4916_v47  ;;  %v2395_v20 = vsel %vm1630_vm3, %v2299_v63, %v4915_v51 }
 0x797   : > { %v2397_v13 = vsel %vm1830_vm5, %v2395_v20, %v4920_v54  ;;  %v2398_v36 = vsel %vm1830_vm5, %v2396_v16, %v4921_v49 }
 0x798   : > { %v2400_v53 = vsel %vm2399_vm6, %v2397_v13, %v4925_v14  ;;  %v2401_v60 = vsel %vm2399_vm6, %v2398_v36, %v4926_v55 }
 0x799   : > { %v5023_v43 = vpop.eup %5022  ;;  %v3976_v24 = vpack.c.bf16 %v2401_v60, %v2400_v53 }
 0x79a   : > { %v3491_v3 = vmul.f32 %v5023_v43, %v5831_v59  ;;  %v5025_v22 = vpop.eup %5024 }
 0x79b   : > { %v3492_v61 = vmul.f32 %v5025_v22, %v5825_v12 }
 0x79c   : > { %v3496_v15 = vpack.c.bf16 %v3491_v3, %v3490_v25 }
 0x79d   : > { %v5027_v63 = vpop.eup %5026 }
 0x79e   : > { %4822 = vmatmul.mubr.msk.bf16.vlgmr.msra.gmra.mxu1 %vm1830_vm5, %v3496_v15  ;;  %v3493_v0 = vmul.f32 %v5027_v63, %v5835_v28 }
 0x79f   : > { %4835 = vmatprep.mubr.msk.bf16.mxu1 %vm662_vm1, %v3976_v24 }
 0x7a0   : > { %v3497_v2 = vpack.c.bf16 %v3493_v0, %v3492_v61 }
 0x7a2   : > { %4828 = vmatmul.mubr.msk.bf16.vlgmr.msra.gmra.mxu0 %vm1830_vm5, %v3497_v2 }
 0x837   : > { %v3535_v44 = vpop.f32.mrf.mxu1 }
 0x839   : > { %v4811_v4 = vpop.f32.mrf.mxu1  ;;  %v3579_v45 = vpop.f32.mrf.mxu0 }
 0x83b   : > { %v3538_v34 = vpop.f32.mrf.mxu1  ;;  %v4817_v62 = vpop.f32.mrf.mxu0 }
 0x83c   : > { %v4944_v62 = vld [vmem:[%s6082_s20 + $0x8] sm:$0xff]  }
 0x83d   : > { %v4812_v59 = vpop.f32.mrf.mxu1  ;;  %v3582_v50 = vpop.f32.mrf.mxu0  ;;  %4831 = vmatprep.subr.bf16.mxu1 %v4944_v62 }
 0x83e   : > { %4832 = vmatpush3.bf16.msra.mxu1 %v4944_v62 }
 0x83f   : > { %v4818_v26 = vpop.f32.mrf.mxu0 }
 0x85e   : > { %v3623_v6 = vpop.f32.mrf.mxu1 }
 0x85f   : > { %v3674_v33 = vcombine.low %v3535_v44, %v3623_v6  ;;  %v3675_v9 = vcombine.high %v3535_v44, %v3623_v6 }
 0x860   : > { %v4823_v10 = vpop.f32.mrf.mxu1 }
 0x861   : > { %v3682_v5 = vrot.slane %v3674_v33, %v5351_v42  ;;  %v3689_v11 = vrot.slane %v3675_v9, %v5351_v42 }
 0x862   : > { %v3626_v12 = vpop.f32.mrf.mxu1  ;;  %v3667_v58 = vpop.f32.mrf.mxu0 }
 0x863   : > { %v3690_v28 = vcombine.low %v3579_v45, %v3667_v58  ;;  %v3691_v7 = vcombine.high %v3579_v45, %v3667_v58  ;;  %v3742_v18 = vcombine.low %v3538_v34, %v3626_v12  ;;  %v3743_v21 = vcombine.high %v3538_v34, %v3626_v12 }
 0x864   : > { %v4824_v8 = vpop.f32.mrf.mxu1  ;;  %v4829_v52 = vpop.f32.mrf.mxu0 }
 0x865   : > { %v3698_v23 = vrot.slane %v3690_v28, %v5351_v42  ;;  %v3705_v29 = vrot.slane %v3691_v7, %v5351_v42  ;;  %v3750_v46 = vrot.slane %v3742_v18, %v5351_v42  ;;  %v3757_v48 = vrot.slane %v3743_v21, %v5351_v42 }
 0x866   : > { %v3670_v31 = vpop.f32.mrf.mxu0 }
 0x867   : > { %v3706_v30 = vcombine.low %v3682_v5, %v3698_v23  ;;  %v3707_v35 = vcombine.high %v3682_v5, %v3698_v23  ;;  %v3722_v37 = vcombine.low %v3689_v11, %v3705_v29  ;;  %v3723_v38 = vcombine.high %v3689_v11, %v3705_v29 }
 0x868   : > { %v3758_v39 = vcombine.low %v3582_v50, %v3670_v31  ;;  %v3759_v32 = vcombine.high %v3582_v50, %v3670_v31  ;;  %v4830_v19 = vpop.f32.mrf.mxu0 }
 0x869   : > { %v3714_v17 = vrot.slane %v3706_v30, %v5370_v1  ;;  %v3721_v27 = vrot.slane %v3707_v35, %v5370_v1  ;;  %v3730_v40 = vrot.slane %v3722_v37, %v5370_v1  ;;  %v3737_v41 = vrot.slane %v3723_v38, %v5370_v1 }
 0x86a   : > { %v3766_v56 = vrot.slane %v3758_v39, %v5351_v42  ;;  %v3773_v47 = vrot.slane %v3759_v32, %v5351_v42 }
 0x86b   : > { %v3810_v51 = vcombine.low %v3714_v17, %v3721_v27  ;;  %v4635_v49 = vcombine.high %v3714_v17, %v3721_v27  ;;  %v3826_v54 = vcombine.low %v3730_v40, %v3737_v41  ;;  %v4636_v16 = vcombine.high %v3730_v40, %v3737_v41 }
 0x86c   : > { %v3774_v20 = vcombine.low %v3750_v46, %v3766_v56  ;;  %v3775_v55 = vcombine.high %v3750_v46, %v3766_v56  ;;  %v3790_v14 = vcombine.low %v3757_v48, %v3773_v47  ;;  %v3791_v57 = vcombine.high %v3757_v48, %v3773_v47 }
 0x86d   : > { %v3817_v13 = vrot.slane %v3810_v51, %v5351_v42  ;;  %v3825_v36 = vrot.slane %v4635_v49, %v5351_v42  ;;  %v3833_v53 = vrot.slane %v3826_v54, %v5351_v42  ;;  %v3841_v60 = vrot.slane %v4636_v16, %v5351_v42 }
 0x86e   : > { %v3782_v43 = vrot.slane %v3774_v20, %v5370_v1  ;;  %v3789_v24 = vrot.slane %v3775_v55, %v5370_v1  ;;  %v3798_v25 = vrot.slane %v3790_v14, %v5370_v1  ;;  %v3805_v3 = vrot.slane %v3791_v57, %v5370_v1  ;;  %v4639_v14 = vld [vmem:[%s6083_s28] ss:$0 sm:$0xff] }
 0x86f   : > { %v3843_v22 = vcombine.high %v3817_v13, %v3825_v36  ;;  %v3859_v15 = vcombine.high %v3833_v53, %v3841_v60  ;;  %v3842_v63 = vcombine.low %v3817_v13, %v3825_v36  ;;  %v3858_v61 = vcombine.low %v3833_v53, %v3841_v60  ;;  %v5052_v60 = vld [vmem:[#allocation2] sm:$0xff] }
 0x870   : > { %v3878_v0 = vcombine.low %v3782_v43, %v3789_v24  ;;  %v4637_v2 = vcombine.high %v3782_v43, %v3789_v24  ;;  %v3894_v44 = vcombine.low %v3798_v25, %v3805_v3  ;;  %v4638_v4 = vcombine.high %v3798_v25, %v3805_v3  ;;  %v5053_v25 = vld [vmem:[#allocation2 + $0x10] sm:$0xff] }
 0x871   : > { %v3850_v45 = vrot.slane %v3842_v63, %v5370_v1  ;;  %v3866_v34 = vrot.slane %v3858_v61, %v5370_v1  ;;  %v3857_v10 = vrot.slane %v3843_v22, %v5370_v1  ;;  %v3873_v33 = vrot.slane %v3859_v15, %v5370_v1  ;;  %v5054_v61 = vld [vmem:[#allocation2 + $0x8] sm:$0xff] }
 0x872   : > { %v3885_v59 = vrot.slane %v3878_v0, %v5351_v42  ;;  %v3893_v50 = vrot.slane %v4637_v2, %v5351_v42  ;;  %v3901_v26 = vrot.slane %v3894_v44, %v5351_v42  ;;  %v3909_v6 = vrot.slane %v4638_v4, %v5351_v42  ;;  %v4945_v42 = vld [vmem:[%s6082_s20] sm:$0xff]   ;;  %v5055_v2 = vld [vmem:[#allocation2 + $0x18] sm:$0xff] }
 0x873   : > { %v3874_v9 = vcombine.low %v3850_v45, %v3866_v34  ;;  %v3876_v23 = vcombine.low %v3857_v10, %v3873_v33  ;;  %v3875_v18 = vcombine.high %v3850_v45, %v3866_v34  ;;  %4833 = vmatprep.subr.bf16.mxu1 %v4945_v42  ;;  %v3877_v38 = vcombine.high %v3857_v10, %v3873_v33 }
 0x874   : > { %v3911_v12 = vcombine.high %v3885_v59, %v3893_v50  ;;  %v3927_v58 = vcombine.high %v3901_v26, %v3909_v6  ;;  %v3910_v28 = vcombine.low %v3885_v59, %v3893_v50  ;;  %v3926_v7 = vcombine.low %v3901_v26, %v3909_v6  ;;  %4834 = vmatpush3.bf16.msra.mxu1 %v4945_v42 }
 0x876   : > { %v3925_v8 = vrot.slane %v3911_v12, %v5370_v1  ;;  %v3941_v52 = vrot.slane %v3927_v58, %v5370_v1  ;;  %v3918_v5 = vrot.slane %v3910_v28, %v5370_v1  ;;  %v3934_v11 = vrot.slane %v3926_v7, %v5370_v1 }
 0x878   : > { %v3944_v29 = vcombine.low %v3925_v8, %v3941_v52  ;;  %v3943_v21 = vcombine.high %v3918_v5, %v3934_v11  ;;  %v3942_v31 = vcombine.low %v3918_v5, %v3934_v11  ;;  %v3945_v37 = vcombine.high %v3925_v8, %v3941_v52 }
 0x87a   : > { %v4932_v30 = vpack.i.bf16 %v3944_v29, %v3876_v23  ;;  %v4927_v35 = vpack.i.bf16 %v3943_v21, %v3875_v18  ;;  %v4937_v39 = vpack.i.bf16 %v3945_v37, %v3877_v38  ;;  %v4946_v21 = vld [vmem:[%s5256_s3 + $0x8] sm:$0xff]  }
 0x87b   : > { %4839 = vmatprep.subr.bf16.mxu0 %v4946_v21 }
 0x87c   : > { %4933 = vrot.lane.b32.xlu0 %v4932_v30, %s5118_s19  ;;  %4928 = vrot.lane.b32.xlu1 %v4927_v35, %s5120_s22 }
 0x87d   : > { %4840 = vmatpush3.bf16.msra.mxu0 %v4946_v21 }
 0x880   : > { %4938 = vrot.lane.b32.xlu1 %v4937_v39, %s5119_s18 }
 0x8ee   : > { %v4934_v1 = vpop.permute.xlu0 %4933  ;;  %v4929_v32 = vpop.permute.xlu1 %4928 }
 0x8ef   : > { %v4931_v19 = vunpack.i.h.bf16 %v4929_v32  ;;  %v4930_v17 = vunpack.i.l.bf16 %v4929_v32  ;;  %v4936_v27 = vunpack.i.h.bf16 %v4934_v1  ;;  %v4935_v40 = vunpack.i.l.bf16 %v4934_v1 }
 0x8f1   : > { %v3970_v41 = vsel %vm1630_vm3, %v3874_v9, %v4930_v17  ;;  %v3971_v46 = vsel %vm1630_vm3, %v3942_v31, %v4931_v19  ;;  %v4947_v31 = vld [vmem:[%s5256_s3] sm:$0xff]  }
 0x8f2   : > { %v4939_v48 = vpop.permute.xlu1 %4938  ;;  %v3972_v51 = vsel %vm1830_vm5, %v3970_v41, %v4935_v40  ;;  %v3973_v49 = vsel %vm1830_vm5, %v3971_v46, %v4936_v27  ;;  %4841 = vmatprep.subr.bf16.mxu0 %v4947_v31 }
 0x8f3   : > { %v4941_v56 = vunpack.i.h.bf16 %v4939_v48  ;;  %v4940_v47 = vunpack.i.l.bf16 %v4939_v48  ;;  %4842 = vmatpush3.bf16.msra.mxu0 %v4947_v31 }
 0x8f5   : > { %v3974_v54 = vsel %vm2399_vm6, %v3972_v51, %v4940_v47  ;;  %v3975_v16 = vsel %vm2399_vm6, %v3973_v49, %v4941_v56  ;;  %v4644_v56 = vld [vmem:[%s621_s27] ss:$0 sm:$0xff] }
 0x8f6   : > { %v3977_v20 = vpack.c.bf16 %v3975_v16, %v3974_v54 }
 0x8f8   : > { %4836 = vmatmul.mubr.msk.bf16.vlgmr.msra.gmra.mxu1 %vm662_vm1, %v3977_v20  ;;  %v4645_v20 = vld [vmem:[%s624_s23] ss:$0 sm:$0xff] }
 0x9b8   : > { %v4837_v55 = vpop.f32.mrf.mxu1 }
 0x9b9   : > { %v4050_v13 = vadd.f32 %v4837_v55, %v4639_v14 }
 0x9ba   : > { %v4041_v57 = vpop.f32.mrf.mxu1 }
 0x9bb   : > { %v4042_v36 = vadd.f32 %v4639_v14, %v4041_v57  ;;  %v5959_v3 = vadd.f32 %v5053_v25, %v4050_v13 }
 0x9bc   : > { %v4838_v53 = vpop.f32.mrf.mxu1 }
 0x9bd   : > { %v5957_v43 = vadd.f32 %v5052_v60, %v4042_v36  ;;  %v4053_v22 = vadd.f32 %v4838_v53, %v4639_v14  ;;  %v4068_v45 = vsel %vm662_vm1, %v5959_v3, 0.0 }
 0x9be   : > { %v4044_v24 = vpop.f32.mrf.mxu1 }
 0x9bf   : > { %v4045_v15 = vadd.f32 %v4639_v14, %v4044_v24  ;;  %v4062_v63 = vsel %vm662_vm1, %v5957_v43, 0.0  ;;  %v5965_v44 = vadd.f32 %v5055_v2, %v4053_v22  ;;  %v4950_v2 = vld [vmem:[%s5266_s17 + $0x28] sm:$0xff]  }
 0x9c0   : > { %4063 = vadd.xlane.f32.xlu0 %v4062_v63  ;;  %v4948_v63 = vld [vmem:[%s5266_s17 + $0x38] sm:$0xff]  }
 0x9c1   : > { %v5963_v0 = vadd.f32 %v5054_v61, %v4045_v15  ;;  %v4071_v34 = vsel %vm662_vm1, %v5965_v44, 0.0  ;;  %4847 = vmatprep.subr.bf16.mxu1 %v4948_v63  ;;  %v4949_v61 = vld [vmem:[%s5266_s17 + $0x30] sm:$0xff]  }
 0x9c2   : > { %4848 = vmatpush3.bf16.msra.mxu1 %v4948_v63 }
 0x9c3   : > { %v4065_v4 = vsel %vm662_vm1, %v5963_v0, 0.0  ;;  %4849 = vmatprep.subr.bf16.mxu1 %v4949_v61 }
 0x9c4   : > { %4066 = vadd.xlane.f32.xlu1 %v4065_v4  ;;  %4069 = vadd.xlane.f32.xlu0 %v4068_v45  ;;  %v4951_v4 = vld [vmem:[%s5266_s17 + $0x20] sm:$0xff]   ;;  %v4952_v45 = vld [vmem:[%s5266_s17 + $0x18] sm:$0xff]  }
 0x9c6   : > { %4850 = vmatpush3.bf16.msra.mxu1 %v4949_v61 }
 0x9c7   : > { %4851 = vmatprep.subr.bf16.mxu1 %v4950_v2 }
 0x9c8   : > { %4072 = vadd.xlane.f32.xlu0 %v4071_v34  ;;  %v4953_v34 = vld [vmem:[%s5266_s17 + $0x10] sm:$0xff]  }
 0x9ca   : > { %4852 = vmatpush3.bf16.msra.mxu1 %v4950_v2 }
 0x9cb   : > { %4853 = vmatprep.subr.bf16.mxu1 %v4951_v4 }
 0x9ce   : > { %4854 = vmatpush3.bf16.msra.mxu1 %v4951_v4 }
 0x9cf   : > { %4855 = vmatprep.subr.bf16.mxu1 %v4952_v45 }
 0x9d2   : > { %4856 = vmatpush3.bf16.msra.mxu1 %v4952_v45 }
 0x9d3   : > { %4857 = vmatprep.subr.bf16.mxu1 %v4953_v34 }
 0x9d6   : > { %4858 = vmatpush3.bf16.msra.mxu1 %v4953_v34 }
 0xa49   : > { %v4064_v62 = vpop.xlane.xlu0 %4063 }
 0xa4a   : > { %v4074_v59 = vmul.f32 0.03125, %v4064_v62  ;;  %v4954_v62 = vld [vmem:[%s5266_s17 + $0x8] sm:$0xff]  }
 0xa4b   : > { %4859 = vmatprep.subr.bf16.mxu1 %v4954_v62 }
 0xa4c   : > { %v4078_v50 = vsub.f32 %v5957_v43, %v4074_v59  ;;  %v4955_v59 = vld [vmem:[%s5266_s17] sm:$0xff]   ;;  %4860 = vmatpush3.bf16.msra.mxu1 %v4954_v62 }
 0xa4d   : > { %v4067_v26 = vpop.xlane.xlu1 %4066  ;;  %v4070_v6 = vpop.xlane.xlu0 %4069  ;;  %4861 = vmatprep.subr.bf16.mxu1 %v4955_v59 }
 0xa4e   : > { %v4075_v10 = vmul.f32 0.03125, %v4067_v26  ;;  %v4076_v33 = vmul.f32 0.03125, %v4070_v6  ;;  %v4082_v9 = vmul.f32 %v4078_v50, %v4078_v50 }
 0xa50   : > { %v4079_v12 = vsub.f32 %v5963_v0, %v4075_v10  ;;  %v4080_v58 = vsub.f32 %v5959_v3, %v4076_v33  ;;  %v4086_v28 = vsel %vm662_vm1, %v4082_v9, 0.0  ;;  %4862 = vmatpush3.bf16.msra.mxu1 %v4955_v59 }
 0xa51   : > { %4087 = vadd.xlane.f32.xlu0 %v4086_v28  ;;  %v4073_v7 = vpop.xlane.xlu0 %4072 }
 0xa52   : > { %v4077_v8 = vmul.f32 0.03125, %v4073_v7  ;;  %v4083_v52 = vmul.f32 %v4079_v12, %v4079_v12  ;;  %v4084_v5 = vmul.f32 %v4080_v58, %v4080_v58 }
 0xa54   : > { %v4081_v11 = vsub.f32 %v5965_v44, %v4077_v8  ;;  %v4089_v42 = vsel %vm662_vm1, %v4083_v52, 0.0  ;;  %v4092_v23 = vsel %vm662_vm1, %v4084_v5, 0.0 }
 0xa55   : > { %4090 = vadd.xlane.f32.xlu1 %v4089_v42  ;;  %4093 = vadd.xlane.f32.xlu0 %v4092_v23 }
 0xa56   : > { %v4085_v29 = vmul.f32 %v4081_v11, %v4081_v11 }
 0xa58   : > { %v4095_v18 = vsel %vm662_vm1, %v4085_v29, 0.0 }
 0xa59   : > { %4096 = vadd.xlane.f32.xlu1 %v4095_v18 }
 0xada   : > { %v4088_v30 = vpop.xlane.xlu0 %4087 }
 0xadb   : > { %v4098_v35 = vmul.f32 0.03125, %v4088_v30 }
 0xadd   : > { %v4102_v37 = vadd.f32 1e-05, %v4098_v35 }
 0xade   : > { %v4091_v38 = vpop.xlane.xlu1 %4090  ;;  %v4094_v39 = vpop.xlane.xlu0 %4093 }
 0xadf   : > { %5028 = vrsqrt.f32 %v4102_v37  ;;  %v4099_v1 = vmul.f32 0.03125, %v4091_v38  ;;  %v4100_v32 = vmul.f32 0.03125, %v4094_v39 }
 0xae1   : > { %v4103_v19 = vadd.f32 1e-05, %v4099_v1  ;;  %v4104_v17 = vadd.f32 1e-05, %v4100_v32 }
 0xae2   : > { %v4097_v27 = vpop.xlane.xlu1 %4096 }
 0xae3   : > { %5030 = vrsqrt.f32 %v4103_v19  ;;  %v4101_v40 = vmul.f32 0.03125, %v4097_v27 }
 0xae4   : > { %5032 = vrsqrt.f32 %v4104_v17 }
 0xae5   : > { %v4105_v41 = vadd.f32 1e-05, %v4101_v40 }
 0xae7   : > { %5034 = vrsqrt.f32 %v4105_v41 }
 0xaec   : > { %v5029_v46 = vpop.eup %5028 }
 0xaed   : > { %v4110_v48 = vmul.f32 %v5029_v46, %v4078_v50  ;;  %v4646_v50 = vld [vmem:[%s632_s5] ss:$0 sm:$0xff] }
 0xaef   : > { %v4120_v54 = vmul.f32 %v4644_v56, %v4110_v48 }
 0xaf0   : > { %v5031_v47 = vpop.eup %5030 }
 0xaf1   : > { %v5033_v51 = vpop.eup %5032  ;;  %v4111_v49 = vmul.f32 %v5031_v47, %v4079_v12  ;;  %v4130_v13 = vadd.f32 %v4645_v20, %v4120_v54  ;;  %v4655_v47 = vld [vmem:[%s640_s21] ss:$0 sm:$0xff] }
 0xaf2   : > { %v4112_v16 = vmul.f32 %v5033_v51, %v4080_v58 }
 0xaf3   : > { %v4121_v55 = vmul.f32 %v4644_v56, %v4111_v49 }
 0xaf4   : > { %v5035_v14 = vpop.eup %5034  ;;  %v4122_v53 = vmul.f32 %v4644_v56, %v4112_v16 }
 0xaf5   : > { %v4113_v57 = vmul.f32 %v5035_v14, %v4081_v11  ;;  %v4131_v36 = vadd.f32 %v4645_v20, %v4121_v55 }
 0xaf6   : > { %v4132_v25 = vadd.f32 %v4645_v20, %v4122_v53 }
 0xaf7   : > { %v4134_v60 = vpack.c.bf16 %v4131_v36, %v4130_v13  ;;  %v4123_v24 = vmul.f32 %v4644_v56, %v4113_v57 }
 0xaf9   : > { %4843 = vmatprep.mubr.msk.bf16.mxu0 %vm662_vm1, %v4134_v60  ;;  %v4133_v22 = vadd.f32 %v4645_v20, %v4123_v24 }
 0xafb   : > { %v4135_v15 = vpack.c.bf16 %v4133_v22, %v4132_v25 }
 0xafd   : > { %4844 = vmatmul.mubr.msk.bf16.vlgmr.msra.gmra.mxu0 %vm662_vm1, %v4135_v15 }
 0xbbd   : > { %v4845_v26 = vpop.f32.mrf.mxu0 }
 0xbbe   : > { %v4208_v6 = vadd.f32 %v4845_v26, %v4646_v50 }
 0xbbf   : > { %v4199_v10 = vpop.f32.mrf.mxu0 }
 0xbc0   : > { %v4653_v33 = vmul.f32 -1.702, %v4208_v6  ;;  %v4200_v9 = vadd.f32 %v4646_v50, %v4199_v10 }
 0xbc1   : > { %v4846_v12 = vpop.f32.mrf.mxu0 }
 0xbc2   : > { %v4226_v58 = vmul.f32 1.442695, %v4653_v33  ;;  %v4651_v28 = vmul.f32 -1.702, %v4200_v9  ;;  %v4211_v7 = vadd.f32 %v4846_v12, %v4646_v50 }
 0xbc3   : > { %v4202_v8 = vpop.f32.mrf.mxu0 }
 0xbc4   : > { %v4222_v52 = vmul.f32 1.442695, %v4651_v28  ;;  %v4654_v5 = vmul.f32 -1.702, %v4211_v7  ;;  %v4203_v11 = vadd.f32 %v4646_v50, %v4202_v8  ;;  %5036 = vpow2.f32 %v4226_v58 }
 0xbc6   : > { %5038 = vpow2.f32 %v4222_v52  ;;  %v4228_v42 = vmul.f32 1.442695, %v4654_v5  ;;  %v4652_v23 = vmul.f32 -1.702, %v4203_v11 }
 0xbc8   : > { %5040 = vpow2.f32 %v4228_v42  ;;  %v4224_v29 = vmul.f32 1.442695, %v4652_v23 }
 0xbca   : > { %5042 = vpow2.f32 %v4224_v29 }
 0xbd1   : > { %v5037_v18 = vpop.eup %5036 }
 0xbd2   : > { %v4232_v35 = vadd.f32 1.0, %v5037_v18 }
 0xbd3   : > { %v5039_v21 = vpop.eup %5038 }
 0xbd4   : > { %v4230_v31 = vadd.f32 1.0, %v5039_v21 }
 0xbd5   : > { %v5041_v30 = vpop.eup %5040 }
 0xbd6   : > { %v4233_v37 = vadd.f32 1.0, %v5041_v30  ;;  %5044 = vrcp.f32 %v4230_v31 }
 0xbd7   : > { %v5043_v38 = vpop.eup %5042 }
 0xbd8   : > { %5046 = vrcp.f32 %v4233_v37  ;;  %v4231_v39 = vadd.f32 1.0, %v5043_v38 }
 0xbd9   : > { %5048 = vrcp.f32 %v4232_v35 }
 0xbda   : > { %5050 = vrcp.f32 %v4231_v39 }
 0xbe3   : > { %v5045_v1 = vpop.eup %5044 }
 0xbe4   : > { %v4242_v40 = vmul.f32 %v5045_v1, %v4200_v9 }
 0xbe5   : > { %v5047_v32 = vpop.eup %5046 }
 0xbe6   : > { %v5049_v19 = vpop.eup %5048  ;;  %v4245_v27 = vmul.f32 %v5047_v32, %v4211_v7 }
 0xbe7   : > { %v5051_v17 = vpop.eup %5050  ;;  %v4244_v46 = vmul.f32 %v5049_v19, %v4208_v6 }
 0xbe8   : > { %v4243_v41 = vmul.f32 %v5051_v17, %v4203_v11 }
 0xbe9   : > { %v4247_v56 = vpack.c.bf16 %v4245_v27, %v4244_v46 }
 0xbea   : > { %v4246_v48 = vpack.c.bf16 %v4243_v41, %v4242_v40 }
 0xbec   : > { %4863 = vmatprep.mubr.bf16.mxu1 %v4246_v48 }
 0xbed   : > { %4864 = vmatmul.mubr.bf16.vlgmr.msra.gmra.mxu1 %v4247_v56 }
 0xcad   : > { %v4865_v51 = vpop.f32.mrf.mxu1 }
 0xcae   : > { %v4362_v49 = vadd.f32 %v4865_v51, %v4655_v47 }
 0xcaf   : > { %v4353_v54 = vpop.f32.mrf.mxu1 }
 0xcb0   : > { %v4370_v16 = vadd.f32 %v4362_v49, %v5959_v3  ;;  %v4354_v20 = vadd.f32 %v4655_v47, %v4353_v54 }
 0xcb1   : > { %v4866_v55 = vpop.f32.mrf.mxu1 }
 0xcb2   : > { %4374 = vst.msk [vmem:[#allocation2 + $0x10] sm:$0xff] %vm662_vm1, %v4370_v16  ;;  %v4368_v14 = vadd.f32 %v4354_v20, %v5957_v43  ;;  %v4365_v57 = vadd.f32 %v4866_v55, %v4655_v47 }
 0xcb3   : > { %v4356_v13 = vpop.f32.mrf.mxu1 }
 0xcb4   : > { %4372 = vst.msk [vmem:[#allocation2] sm:$0xff] %vm662_vm1, %v4368_v14  ;;  %v4371_v36 = vadd.f32 %v4365_v57, %v5965_v44  ;;  %v4357_v53 = vadd.f32 %v4655_v47, %v4356_v13  ;;  %4379 = sbr.rel (%p4664_p6) target bundleno = 3259 (0xcbb), region = 80 }
 0xcb6   : > { %4375 = vst.msk [vmem:[#allocation2 + $0x18] sm:$0xff] %vm662_vm1, %v4371_v36  ;;  %v4369_v60 = vadd.f32 %v4357_v53, %v5963_v0 }
 0xcb8   : > { %4373 = vst.msk [vmem:[#allocation2 + $0x8] sm:$0xff] %vm662_vm1, %v4369_v60 }
 0xcb9   : > { %4380 = vst.msk [vmem:[#allocation3] sm:$0xff] %vm662_vm1, %v4368_v14  ;;  %4381 = vst.msk [vmem:[#allocation3 + $0x8] sm:$0xff] %vm662_vm1, %v4369_v60 }
 0xcba   : > { %4382 = vst.msk [vmem:[#allocation3 + $0x10] sm:$0xff] %vm662_vm1, %v4370_v16  ;;  %4383 = vst.msk [vmem:[#allocation3 + $0x18] sm:$0xff] %vm662_vm1, %v4371_v36 }
 0xcbb PF: > { %s6084_s30 = sld [smem:[#allocation7_spill]]  ;;  %s5121_s16 = smov [#allocation3]  }
 0xcbc   : > { %s4394_s19 = sshll.u32 %s5121_s16, 4  ;;  %s4395_s19 = int_to_ptr.vmem [resolvable:$true] %s4394_s19 }
 0xcbd   : > { %s5056_s25 = scalar_lea.vmem %s4395_s19, 512  ;;  %p5063_p11 = scmp.lt.s32.totalorder %s4395_s19, %s4395_s19 }
 0xcbe   : > { %p5057_p8 = scmp.ne.s32.totalorder %s4395_s19, %s5056_s25  ;;  %p5064_p12 = scmp.lt.s32.totalorder %s5056_s25, %s5056_s25 }
 0xcc0   : > { %p5065_p13 = por %p5064_p12, %p5063_p11 }
 0xcc1   : > { %s6085_s21 = sadd.s32 4294967295, %s6084_s30  }
 0xcc2   : > { %p6028_p7 = scmp.eq.s32.totalorder %s6085_s21, 1 }
 0xcc4   : > { %p5058_p9 = pnand %p5057_p8, %p6028_p7 }
 0xcc6   : > { %p5059_p10 = pneg %p5058_p9 }
 0xcc8   : > { %p5066_p0 = pnand %p5065_p13, %p5059_p10 }
 0xcca   : > { %5069 = shalt.err (!%p5066_p0)
}
 0xccb   : > { %s5122_s18 = smov 128   ;;  %s6087_s14 = sld [smem:[#allocation12_spill]] }
 0xcd1   : > { %4868 = dma.vmem_to_hbm [thread:$0]  (%p6028_p7), %s4395_s19, 512, %s6087_s14, [#allocation4], %s5122_s18, %s5122_s18, %s5120_s22  }
 0xcd2   : > { %5093 = dma.done.wait (%p6028_p7), [#allocation4], 512  }
 0xcd3   : > { %5095 = vsyncadd (%p6028_p7), [#allocation4], 4294966784 }
 0xcd4 PF: > { %s6088_s28 = sld [smem:[#allocation7_spill]] }
 0xcd5   : > { %s6089_s25 = sld [smem:[#allocation6_spill]] }
 0xcd6   : > { %s6090_s26 = sld [smem:[#allocation8_spill]] }
 0xcda   : > { %s24_s27 = sadd.s32 1, %s6088_s28  }
 0xcdb   : > { %p21_p1 = scmp.ge.s32.totalorder %s24_s27, 4  }
 0xcdd   :  { %23 = sbr.rel (!%p21_p1) target bundleno = 6 (0x6), region = 144 }
 0xce2   :  { %4410 = vsyncpa [#allocation4], 1 }
 0xce3   :  { %4412 = vsyncpa [#allocation4 + $0x1], 1 }

</bundles_post_ra>
